<compile_context>
chip_gen: v7x
topology: tpu7x:2x2x1
jax: 0.10.0
libtpu: 0.0.40
codegen_flags: <defaults>
</compile_context>

<pallas_src>
import functools
import numpy as np
import jax
import jax.numpy as jnp
from jax.experimental import pallas as pl
from jax.experimental.pallas import tpu as pltpu

C_IN = 27
HIDDEN = 128     # hidden_dim
C2 = 256
K1 = 7
K2 = 4
POOL = 20        # AvgPool1d(20)
FC_IN = 2 * C2   # 512
FC_OUT = 2


def _round_up(x, m):
    return (x + m - 1) // m * m


def _conv_net_kernel(x1c_ref, x2c_ref, pool_ref, w1_ref, b1_ref,
                     w2_ref, b2_ref, wf1_ref, wf2_ref, bf_ref, out_ref):
    mc = pool_ref.shape[1]                                 # valid conv2 rows / block

    def seq_feature(xc_ref):
        # conv1: single im2col matmul, bf16 x bf16 -> f32 accumulate.
        y1 = jnp.dot(xc_ref[...], w1_ref[...],
                     preferred_element_type=jnp.float32) + b1_ref[...]
        y1 = y1.astype(jnp.bfloat16)                       # (M_blk, 128)
        # conv2: im2col along lanes -> single (mc, 512) @ (512, 256) matmul.
        y1c = jnp.concatenate([y1[k:k + mc, :] for k in range(K2)], axis=1)
        y2 = jnp.dot(y1c, w2_ref[...],
                     preferred_element_type=jnp.float32) + b2_ref[...]
        # AvgPool1d(20) + mean over pooled positions == mean over first T*20
        # rows of each sequence; done as one small pooling-matrix matmul.
        return jnp.dot(pool_ref[...], y2,
                       preferred_element_type=jnp.float32)  # (NB, 256)

    f1 = seq_feature(x1c_ref)
    f2 = seq_feature(x2c_ref)
    # fc1 without a lane concat: wf split into x1-half and x2-half, summed.
    out = (jnp.dot(f1, wf1_ref[...], preferred_element_type=jnp.float32)
           + jnp.dot(f2, wf2_ref[...], preferred_element_type=jnp.float32)
           + bf_ref[...])                                   # (NB, 2)
    out_ref[...] = out.reshape(out_ref.shape).astype(out_ref.dtype)


@functools.partial(jax.jit, static_argnames=("block_b",))
def conv_network_forward(x1, x2, w1, b1, w2, b2, wf, bf, *, block_b=8):
    """x1, x2: (B, L, 27) float32. Returns logits (B, 2) float32."""
    B, L, _ = x1.shape
    L1 = L - (K1 - 1)                   # after conv1
    L2 = L1 - (K2 - 1)                  # after conv2
    T = L2 // POOL                      # pooled positions
    assert T >= 1, "sequence too short for AvgPool1d(20)"

    NB = min(block_b, B)                # sequences (per input) per grid step
    n_blocks = pl.cdiv(B, NB)
    B_pad = n_blocks * NB
    SEQ = _round_up(L1, 8)              # per-sequence row stride in im2col
    KP1 = _round_up(K1 * C_IN, 128)     # conv1 contraction padded to 256 lanes
    M_BLK = NB * SEQ                    # conv1 matmul M per grid step
    MC = M_BLK - (K2 - 1)               # conv2 matmul M per grid step

    def im2col(x):                      # (B, L, 27) -> (B_pad*SEQ, 256) bf16
        xc = jnp.concatenate([x[:, k:k + L1, :] for k in range(K1)], axis=2)
        xc = jnp.pad(xc, ((0, B_pad - B), (0, SEQ - L1),
                          (0, KP1 - K1 * C_IN)))
        return xc.reshape(B_pad * SEQ, KP1).astype(jnp.bfloat16)

    x1c = im2col(x1)
    x2c = im2col(x2)

    # Conv weights reshaped to im2col layout (k major, c minor), bf16.
    w1c = jnp.transpose(w1, (2, 1, 0)).reshape(K1 * C_IN, HIDDEN)
    w1c = jnp.pad(w1c, ((0, KP1 - K1 * C_IN), (0, 0))).astype(jnp.bfloat16)
    w2c = jnp.transpose(w2, (2, 1, 0)).reshape(K2 * HIDDEN, C2).astype(jnp.bfloat16)
    b1k = b1.reshape(1, HIDDEN).astype(jnp.float32)
    b2k = b2.reshape(1, C2).astype(jnp.float32)
    wf1 = wf[:, :C2].T.astype(jnp.float32)      # applies to x1 features
    wf2 = wf[:, C2:].T.astype(jnp.float32)      # applies to x2 features
    bfk = bf.reshape(1, FC_OUT).astype(jnp.float32)

    # Static pooling matrix: row s averages the first T*POOL conv2 rows of
    # sequence s inside the block; padded/invalid rows get weight 0.
    pool_np = np.zeros((NB, MC), np.float32)
    for s in range(NB):
        pool_np[s, s * SEQ:s * SEQ + T * POOL] = 1.0 / (T * POOL)
    pool = jnp.asarray(pool_np)

    out = pl.pallas_call(
        _conv_net_kernel,
        out_shape=jax.ShapeDtypeStruct((B_pad, 1, FC_OUT), jnp.float32),
        grid_spec=pltpu.PrefetchScalarGridSpec(
            num_scalar_prefetch=0,
            grid=(n_blocks,),
            in_specs=[
                pl.BlockSpec((M_BLK, KP1), lambda b: (b, 0)),        # x1 im2col
                pl.BlockSpec((M_BLK, KP1), lambda b: (b, 0)),        # x2 im2col
                pl.BlockSpec((NB, MC), lambda b: (0, 0)),            # pooling mat
                pl.BlockSpec((KP1, HIDDEN), lambda b: (0, 0)),       # w1 (im2col)
                pl.BlockSpec((1, HIDDEN), lambda b: (0, 0)),         # b1
                pl.BlockSpec((K2 * HIDDEN, C2), lambda b: (0, 0)),   # w2 (im2col)
                pl.BlockSpec((1, C2), lambda b: (0, 0)),             # b2
                pl.BlockSpec((C2, FC_OUT), lambda b: (0, 0)),        # fc x1-half
                pl.BlockSpec((C2, FC_OUT), lambda b: (0, 0)),        # fc x2-half
                pl.BlockSpec((1, FC_OUT), lambda b: (0, 0)),         # fc bias
            ],
            out_specs=pl.BlockSpec((NB, 1, FC_OUT), lambda b: (b, 0, 0)),
        ),
        compiler_params=pltpu.CompilerParams(
            dimension_semantics=("parallel",)),
    )(x1c, x2c, pool, w1c, b1k, w2c, b2k, wf1, wf2, bfk)
    return out[:B, 0, :]


def _reference_forward(x1, x2, w1, b1, w2, b2, wf, bf):
    """Plain-JAX f32 reference mirroring the PyTorch forward exactly."""
    def seq(x):
        xt = jnp.transpose(x, (0, 2, 1))               # (B, 27, L)
        y1 = jax.lax.conv_general_dilated(
            xt, w1, (1,), 'VALID',
            dimension_numbers=('NCH', 'OIH', 'NCH')) + b1[None, :, None]
        y2 = jax.lax.conv_general_dilated(
            y1, w2, (1,), 'VALID',
            dimension_numbers=('NCH', 'OIH', 'NCH')) + b2[None, :, None]
        L2 = y2.shape[2]
        T = L2 // POOL
        z = y2[:, :, :T * POOL].reshape(y2.shape[0], C2, T, POOL).mean(-1)
        return z                                        # (B, 256, T)
    z1, z2 = seq(x1), seq(x2)
    x = jnp.concatenate([jnp.transpose(z1, (0, 2, 1)),
                         jnp.transpose(z2, (0, 2, 1))], axis=2)  # (B, T, 512)
    x = jnp.mean(x, axis=1)                             # (B, 512)
    return x @ wf.T + bf


def _xavier_uniform(key, shape, fan_in, fan_out):
    bound = float(np.sqrt(6.0 / (fan_in + fan_out)))
    return jax.random.uniform(key, shape, jnp.float32, -bound, bound)


if __name__ == "__main__":
    B, L = 8, 49   # L=49 -> conv1: 43 -> conv2: 40 -> AvgPool1d(20): T=2

    key = jax.random.PRNGKey(0)
    k_x1, k_x2, k_w1, k_w2, k_wf = jax.random.split(key, 5)

    # Deterministic parameter init matching the module's __init__ shapes
    # (PyTorch layouts: conv (out, in, K), linear (out, in); biases zero).
    w1 = _xavier_uniform(k_w1, (HIDDEN, C_IN, K1), C_IN * K1, HIDDEN * K1)
    b1 = jnp.zeros((HIDDEN,), jnp.float32)
    w2 = _xavier_uniform(k_w2, (C2, HIDDEN, K2), HIDDEN * K2, C2 * K2)
    b2 = jnp.zeros((C2,), jnp.float32)
    wf = _xavier_uniform(k_wf, (FC_OUT, FC_IN), FC_IN, FC_OUT)
    bf = jnp.zeros((FC_OUT,), jnp.float32)

    x1 = jax.random.normal(k_x1, (B, L, C_IN), jnp.float32)
    x2 = jax.random.normal(k_x2, (B, L, C_IN), jnp.float32)

    # block_b=4 -> 2 "parallel" grid steps (feeds both v7x TensorCores),
    # 4 x1 + 4 x2 sequences batched per step.
    out = conv_network_forward(x1, x2, w1, b1, w2, b2, wf, bf, block_b=4)
    out = jax.block_until_ready(out)

    ref = _reference_forward(x1, x2, w1, b1, w2, b2, wf, bf)
    # Looser tolerance than the pure-f32 version: conv matmuls use bf16
    # operands (f32 accumulate) per the perf review.
    np.testing.assert_allclose(np.asarray(out), np.asarray(ref),
                               rtol=5e-2, atol=5e-2)
    print("KERNEL_OK")
</pallas_src>

<mosaic_0001>
module attributes {stable_mosaic.version = 11 : i64} {
  func.func @_conv_net_kernel(%arg0: i32, %arg1: memref<192x256xbf16, #tpu.memory_space<vmem>>, %arg2: memref<192x256xbf16, #tpu.memory_space<vmem>>, %arg3: memref<4x189xf32, #tpu.memory_space<vmem>>, %arg4: memref<256x128xbf16, #tpu.memory_space<vmem>>, %arg5: memref<1x128xf32, #tpu.memory_space<vmem>>, %arg6: memref<512x256xbf16, #tpu.memory_space<vmem>>, %arg7: memref<1x256xf32, #tpu.memory_space<vmem>>, %arg8: memref<256x2xf32, #tpu.memory_space<vmem>>, %arg9: memref<256x2xf32, #tpu.memory_space<vmem>>, %arg10: memref<1x2xf32, #tpu.memory_space<vmem>>, %arg11: memref<4x1x2xf32, #tpu.memory_space<vmem>>) attributes {dimension_semantics = [#tpu.dimension_semantics<parallel>], iteration_bounds = array<i64: 2>, scalar_prefetch = 0 : i64, scratch_operands = 0 : i64, tpu.core_type = #tpu.core_type<tc>, window_params = [{transform_indices = @transform_0, window_bounds = array<i64: 192, 256>}, {transform_indices = @transform_1, window_bounds = array<i64: 192, 256>}, {pipeline_mode = #tpu.pipeline_mode<synchronous>, transform_indices = @transform_2, window_bounds = array<i64: 4, 189>}, {pipeline_mode = #tpu.pipeline_mode<synchronous>, transform_indices = @transform_3, window_bounds = array<i64: 256, 128>}, {pipeline_mode = #tpu.pipeline_mode<synchronous>, transform_indices = @transform_4, window_bounds = array<i64: 1, 128>}, {pipeline_mode = #tpu.pipeline_mode<synchronous>, transform_indices = @transform_5, window_bounds = array<i64: 512, 256>}, {pipeline_mode = #tpu.pipeline_mode<synchronous>, transform_indices = @transform_6, window_bounds = array<i64: 1, 256>}, {pipeline_mode = #tpu.pipeline_mode<synchronous>, transform_indices = @transform_7, window_bounds = array<i64: 256, 2>}, {pipeline_mode = #tpu.pipeline_mode<synchronous>, transform_indices = @transform_8, window_bounds = array<i64: 256, 2>}, {pipeline_mode = #tpu.pipeline_mode<synchronous>, transform_indices = @transform_9, window_bounds = array<i64: 1, 2>}, {transform_indices = @transform_10, window_bounds = array<i64: 4, 1, 2>}]} {
    %c0 = arith.constant 0 : index
    %c0_0 = arith.constant 0 : index
    %0 = vector.load %arg1[%c0, %c0_0] : memref<192x256xbf16, #tpu.memory_space<vmem>>, vector<192x256xbf16>
    %c0_1 = arith.constant 0 : index
    %c0_2 = arith.constant 0 : index
    %1 = vector.load %arg4[%c0_1, %c0_2] : memref<256x128xbf16, #tpu.memory_space<vmem>>, vector<256x128xbf16>
    %cst = arith.constant dense<0.000000e+00> : vector<192x128xf32>
    %2 = tpu.matmul %0, %1, %cst {dimension_numbers = #tpu.dot_dimension_numbers<[1], [0], [0], [1], [0, 0, 1, 1], [], []>} : vector<192x256xbf16>, vector<256x128xbf16>, vector<192x128xf32> -> vector<192x128xf32>
    %c0_3 = arith.constant 0 : index
    %c0_4 = arith.constant 0 : index
    %3 = vector.load %arg5[%c0_3, %c0_4] : memref<1x128xf32, #tpu.memory_space<vmem>>, vector<1x128xf32>
    %4 = vector.broadcast %3 : vector<1x128xf32> to vector<192x128xf32>
    %5 = arith.addf %2, %4 : vector<192x128xf32>
    %6 = arith.truncf %5 : vector<192x128xf32> to vector<192x128xbf16>
    %7 = vector.extract_strided_slice %6 {offsets = [0, 0], sizes = [189, 128], strides = [1, 1]} : vector<192x128xbf16> to vector<189x128xbf16>
    %8 = vector.extract_strided_slice %6 {offsets = [1, 0], sizes = [189, 128], strides = [1, 1]} : vector<192x128xbf16> to vector<189x128xbf16>
    %9 = vector.extract_strided_slice %6 {offsets = [2, 0], sizes = [189, 128], strides = [1, 1]} : vector<192x128xbf16> to vector<189x128xbf16>
    %10 = vector.extract_strided_slice %6 {offsets = [3, 0], sizes = [189, 128], strides = [1, 1]} : vector<192x128xbf16> to vector<189x128xbf16>
    %11 = tpu.concatenate %7, %8, %9, %10 in 1 : vector<189x128xbf16>, vector<189x128xbf16>, vector<189x128xbf16>, vector<189x128xbf16> -> vector<189x512xbf16>
    %c0_5 = arith.constant 0 : index
    %c0_6 = arith.constant 0 : index
    %12 = vector.load %arg6[%c0_5, %c0_6] : memref<512x256xbf16, #tpu.memory_space<vmem>>, vector<512x256xbf16>
    %cst_7 = arith.constant dense<0.000000e+00> : vector<189x256xf32>
    %13 = tpu.matmul %11, %12, %cst_7 {dimension_numbers = #tpu.dot_dimension_numbers<[1], [0], [0], [1], [0, 0, 1, 1], [], []>} : vector<189x512xbf16>, vector<512x256xbf16>, vector<189x256xf32> -> vector<189x256xf32>
    %c0_8 = arith.constant 0 : index
    %c0_9 = arith.constant 0 : index
    %14 = vector.load %arg7[%c0_8, %c0_9] : memref<1x256xf32, #tpu.memory_space<vmem>>, vector<1x256xf32>
    %15 = vector.broadcast %14 : vector<1x256xf32> to vector<189x256xf32>
    %16 = arith.addf %13, %15 : vector<189x256xf32>
    %c0_10 = arith.constant 0 : index
    %c0_11 = arith.constant 0 : index
    %17 = vector.load %arg3[%c0_10, %c0_11] : memref<4x189xf32, #tpu.memory_space<vmem>>, vector<4x189xf32>
    %cst_12 = arith.constant dense<0.000000e+00> : vector<4x256xf32>
    %18 = tpu.matmul %17, %16, %cst_12 {dimension_numbers = #tpu.dot_dimension_numbers<[1], [0], [0], [1], [0, 0, 1, 1], [], []>} : vector<4x189xf32>, vector<189x256xf32>, vector<4x256xf32> -> vector<4x256xf32>
    %c0_13 = arith.constant 0 : index
    %c0_14 = arith.constant 0 : index
    %19 = vector.load %arg2[%c0_13, %c0_14] : memref<192x256xbf16, #tpu.memory_space<vmem>>, vector<192x256xbf16>
    %c0_15 = arith.constant 0 : index
    %c0_16 = arith.constant 0 : index
    %20 = vector.load %arg4[%c0_15, %c0_16] : memref<256x128xbf16, #tpu.memory_space<vmem>>, vector<256x128xbf16>
    %cst_17 = arith.constant dense<0.000000e+00> : vector<192x128xf32>
    %21 = tpu.matmul %19, %20, %cst_17 {dimension_numbers = #tpu.dot_dimension_numbers<[1], [0], [0], [1], [0, 0, 1, 1], [], []>} : vector<192x256xbf16>, vector<256x128xbf16>, vector<192x128xf32> -> vector<192x128xf32>
    %c0_18 = arith.constant 0 : index
    %c0_19 = arith.constant 0 : index
    %22 = vector.load %arg5[%c0_18, %c0_19] : memref<1x128xf32, #tpu.memory_space<vmem>>, vector<1x128xf32>
    %23 = vector.broadcast %22 : vector<1x128xf32> to vector<192x128xf32>
    %24 = arith.addf %21, %23 : vector<192x128xf32>
    %25 = arith.truncf %24 : vector<192x128xf32> to vector<192x128xbf16>
    %26 = vector.extract_strided_slice %25 {offsets = [0, 0], sizes = [189, 128], strides = [1, 1]} : vector<192x128xbf16> to vector<189x128xbf16>
    %27 = vector.extract_strided_slice %25 {offsets = [1, 0], sizes = [189, 128], strides = [1, 1]} : vector<192x128xbf16> to vector<189x128xbf16>
    %28 = vector.extract_strided_slice %25 {offsets = [2, 0], sizes = [189, 128], strides = [1, 1]} : vector<192x128xbf16> to vector<189x128xbf16>
    %29 = vector.extract_strided_slice %25 {offsets = [3, 0], sizes = [189, 128], strides = [1, 1]} : vector<192x128xbf16> to vector<189x128xbf16>
    %30 = tpu.concatenate %26, %27, %28, %29 in 1 : vector<189x128xbf16>, vector<189x128xbf16>, vector<189x128xbf16>, vector<189x128xbf16> -> vector<189x512xbf16>
    %c0_20 = arith.constant 0 : index
    %c0_21 = arith.constant 0 : index
    %31 = vector.load %arg6[%c0_20, %c0_21] : memref<512x256xbf16, #tpu.memory_space<vmem>>, vector<512x256xbf16>
    %cst_22 = arith.constant dense<0.000000e+00> : vector<189x256xf32>
    %32 = tpu.matmul %30, %31, %cst_22 {dimension_numbers = #tpu.dot_dimension_numbers<[1], [0], [0], [1], [0, 0, 1, 1], [], []>} : vector<189x512xbf16>, vector<512x256xbf16>, vector<189x256xf32> -> vector<189x256xf32>
    %c0_23 = arith.constant 0 : index
    %c0_24 = arith.constant 0 : index
    %33 = vector.load %arg7[%c0_23, %c0_24] : memref<1x256xf32, #tpu.memory_space<vmem>>, vector<1x256xf32>
    %34 = vector.broadcast %33 : vector<1x256xf32> to vector<189x256xf32>
    %35 = arith.addf %32, %34 : vector<189x256xf32>
    %c0_25 = arith.constant 0 : index
    %c0_26 = arith.constant 0 : index
    %36 = vector.load %arg3[%c0_25, %c0_26] : memref<4x189xf32, #tpu.memory_space<vmem>>, vector<4x189xf32>
    %cst_27 = arith.constant dense<0.000000e+00> : vector<4x256xf32>
    %37 = tpu.matmul %36, %35, %cst_27 {dimension_numbers = #tpu.dot_dimension_numbers<[1], [0], [0], [1], [0, 0, 1, 1], [], []>} : vector<4x189xf32>, vector<189x256xf32>, vector<4x256xf32> -> vector<4x256xf32>
    %c0_28 = arith.constant 0 : index
    %c0_29 = arith.constant 0 : index
    %38 = vector.load %arg8[%c0_28, %c0_29] : memref<256x2xf32, #tpu.memory_space<vmem>>, vector<256x2xf32>
    %cst_30 = arith.constant dense<0.000000e+00> : vector<4x2xf32>
    %39 = tpu.matmul %18, %38, %cst_30 {dimension_numbers = #tpu.dot_dimension_numbers<[1], [0], [0], [1], [0, 0, 1, 1], [], []>} : vector<4x256xf32>, vector<256x2xf32>, vector<4x2xf32> -> vector<4x2xf32>
    %c0_31 = arith.constant 0 : index
    %c0_32 = arith.constant 0 : index
    %40 = vector.load %arg9[%c0_31, %c0_32] : memref<256x2xf32, #tpu.memory_space<vmem>>, vector<256x2xf32>
    %cst_33 = arith.constant dense<0.000000e+00> : vector<4x2xf32>
    %41 = tpu.matmul %37, %40, %cst_33 {dimension_numbers = #tpu.dot_dimension_numbers<[1], [0], [0], [1], [0, 0, 1, 1], [], []>} : vector<4x256xf32>, vector<256x2xf32>, vector<4x2xf32> -> vector<4x2xf32>
    %42 = arith.addf %39, %41 : vector<4x2xf32>
    %c0_34 = arith.constant 0 : index
    %c0_35 = arith.constant 0 : index
    %43 = vector.load %arg10[%c0_34, %c0_35] : memref<1x2xf32, #tpu.memory_space<vmem>>, vector<1x2xf32>
    %44 = vector.broadcast %43 : vector<1x2xf32> to vector<4x2xf32>
    %45 = arith.addf %42, %44 : vector<4x2xf32>
    %46 = vector.shape_cast %45 : vector<4x2xf32> to vector<4x1x2xf32>
    %c0_36 = arith.constant 0 : index
    %c0_37 = arith.constant 0 : index
    %c0_38 = arith.constant 0 : index
    %47 = vector.load %arg11[%c0_36, %c0_37, %c0_38] : memref<4x1x2xf32, #tpu.memory_space<vmem>>, vector<4x1x2xf32>
    tpu.vector_store %arg11[%c0_36, %c0_37, %c0_38], %46 {strides = array<i32>} : memref<4x1x2xf32, #tpu.memory_space<vmem>>, vector<4x1x2xf32>,
    return
  }
  func.func @transform_0(%arg0: i32) -> (i32, i32) {
    %c0_i32 = arith.constant 0 : i32
    %c0_i32_0 = arith.constant 0 : i32
    return %arg0, %c0_i32 : i32, i32
  }
  func.func @transform_1(%arg0: i32) -> (i32, i32) {
    %c0_i32 = arith.constant 0 : i32
    %c0_i32_0 = arith.constant 0 : i32
    return %arg0, %c0_i32 : i32, i32
  }
  func.func @transform_2(%arg0: i32) -> (i32, i32) {
    %c0_i32 = arith.constant 0 : i32
    %c0_i32_0 = arith.constant 0 : i32
    %c0_i32_1 = arith.constant 0 : i32
    return %c0_i32, %c0_i32_0 : i32, i32
  }
  func.func @transform_3(%arg0: i32) -> (i32, i32) {
    %c0_i32 = arith.constant 0 : i32
    %c0_i32_0 = arith.constant 0 : i32
    %c0_i32_1 = arith.constant 0 : i32
    return %c0_i32, %c0_i32_0 : i32, i32
  }
  func.func @transform_4(%arg0: i32) -> (i32, i32) {
    %c0_i32 = arith.constant 0 : i32
    %c0_i32_0 = arith.constant 0 : i32
    %c0_i32_1 = arith.constant 0 : i32
    return %c0_i32, %c0_i32_0 : i32, i32
  }
  func.func @transform_5(%arg0: i32) -> (i32, i32) {
    %c0_i32 = arith.constant 0 : i32
    %c0_i32_0 = arith.constant 0 : i32
    %c0_i32_1 = arith.constant 0 : i32
    return %c0_i32, %c0_i32_0 : i32, i32
  }
  func.func @transform_6(%arg0: i32) -> (i32, i32) {
    %c0_i32 = arith.constant 0 : i32
    %c0_i32_0 = arith.constant 0 : i32
    %c0_i32_1 = arith.constant 0 : i32
    return %c0_i32, %c0_i32_0 : i32, i32
  }
  func.func @transform_7(%arg0: i32) -> (i32, i32) {
    %c0_i32 = arith.constant 0 : i32
    %c0_i32_0 = arith.constant 0 : i32
    %c0_i32_1 = arith.constant 0 : i32
    return %c0_i32, %c0_i32_0 : i32, i32
  }
  func.func @transform_8(%arg0: i32) -> (i32, i32) {
    %c0_i32 = arith.constant 0 : i32
    %c0_i32_0 = arith.constant 0 : i32
    %c0_i32_1 = arith.constant 0 : i32
    return %c0_i32, %c0_i32_0 : i32, i32
  }
  func.func @transform_9(%arg0: i32) -> (i32, i32) {
    %c0_i32 = arith.constant 0 : i32
    %c0_i32_0 = arith.constant 0 : i32
    %c0_i32_1 = arith.constant 0 : i32
    return %c0_i32, %c0_i32_0 : i32, i32
  }
  func.func @transform_10(%arg0: i32) -> (i32, i32, i32) {
    %c0_i32 = arith.constant 0 : i32
    %c0_i32_0 = arith.constant 0 : i32
    %c0_i32_1 = arith.constant 0 : i32
    return %arg0, %c0_i32, %c0_i32_0 : i32, i32, i32
  }
}

</mosaic_0001>

<bundles_post_ra>
// kernel: conv_network_forward.1
= control target key start
LH: loop header
LB: loop body
LE: loop exit
PB: predicated region body
PF: predicated region fallthrough
CT: control target
= control target key end

     0   :  { %s4095_s13 = smov 0   ;;  %s5222_s0 = inlined_call_operand.vmem [shape: bf16[384,256], index: 0, kind: input, shape index: {}]   ;;  %s5223_s1 = inlined_call_operand.vmem [shape: bf16[384,256], index: 1, kind: input, shape index: {}]   ;;  %s5224_s2 = inlined_call_operand.vmem [shape: f32[4,189], index: 2, kind: input, shape index: {}]   ;;  %s5225_s3 = inlined_call_operand.vmem [shape: bf16[256,128], index: 3, kind: input, shape index: {}]   ;;  %s5226_s4 = inlined_call_operand.vmem [shape: f32[1,128], index: 4, kind: input, shape index: {}]   ;;  %s5227_s5 = inlined_call_operand.vmem [shape: bf16[512,256], index: 5, kind: input, shape index: {}]   ;;  %s5228_s6 = inlined_call_operand.vmem [shape: f32[1,256], index: 6, kind: input, shape index: {}]   ;;  %s5229_s7 = inlined_call_operand.vmem [shape: f32[256,2], index: 7, kind: input, shape index: {}]   ;;  %s5230_s8 = inlined_call_operand.vmem [shape: f32[256,2], index: 8, kind: input, shape index: {}]   ;;  %s5231_s9 = inlined_call_operand.vmem [shape: f32[1,2], index: 9, kind: input, shape index: {}]   ;;  %s5232_s10 = inlined_call_operand.vmem [shape: f32[8,1,2], index: 10, kind: output, shape index: {}]  }
   0x1 LB: > { %s3001_s14 = sadd.s32 4294967295, %s4036_s13   ;;  %p3005_p0 = scmp.ge.s32.totalorder %s4036_s13, 1  ;;  %s4036_s13 = sphi %s4095_s13, %s20_s13  }
   0x2   : > { %p326_p1 = scmp.lt.s32.totalorder %s4036_s13, 3 }
   0x4   : > { %p327_p2 = pnand %p3005_p0, %p326_p1 }
   0x5   : > { %v3763_v0 = vld [vmem:[%s5225_s3 + $0x40] sm:$0xff] (!%p327_p2)   ;;  %s370_s17 = smul.u32 (!%p327_p2), 24, %s3001_s14  ;;  %v3765_v2 = vld [vmem:[%s5225_s3 + $0x48] sm:$0xff] (!%p327_p2)   ;;  %v3767_v4 = vld [vmem:[%s5225_s3 + $0x50] sm:$0xff] (!%p327_p2)   ;;  %vm930_vm0 = vcmask (!%p327_p2), 1046528   ;;  %vm1731_vm3 = vcmask (!%p327_p2), 498688  }
   0x6   : > { %330 = sbr.rel (%p327_p2) target bundleno = 1828 (0x724), region = 60  ;;  %v3764_v1 = vld [vmem:[%s5225_s3] sm:$0xff] (!%p327_p2)   ;;  %3151 = vmatprep.subr.bf16.mxu1 (!%p327_p2), %v3763_v0  ;;  %v3766_v3 = vld [vmem:[%s5225_s3 + $0x8] sm:$0xff] (!%p327_p2)   ;;  %v3768_v5 = vld [vmem:[%s5225_s3 + $0x10] sm:$0xff] (!%p327_p2)   ;;  %vm810_vm1 = vsmask.f32 (!%p327_p2), 7424 }
   0x7   : > { %3152 = vmatpush3.bf16.msra.mxu1 (!%p327_p2), %v3764_v1  ;;  %p371_p3 = scmp.lt.s32.totalorder (!%p327_p2), %s370_s17, 47  ;;  %v3769_v6 = vld [vmem:[%s5225_s3 + $0x58] sm:$0xff] (!%p327_p2)   ;;  %v3771_v8 = vld [vmem:[%s5225_s3 + $0x60] sm:$0xff] (!%p327_p2)   ;;  %v3773_v10 = vld [vmem:[%s5225_s3 + $0x68] sm:$0xff] (!%p327_p2)   ;;  %vm966_vm2 = vsmask.f32 (!%p327_p2), 6400 }
   0x8   : > { %3153 = vmatprep.subr.bf16.mxu1 (!%p327_p2), %v3765_v2  ;;  %v3770_v7 = vld [vmem:[%s5225_s3 + $0x18] sm:$0xff] (!%p327_p2)   ;;  %v3772_v9 = vld [vmem:[%s5225_s3 + $0x20] sm:$0xff] (!%p327_p2)   ;;  %v3774_v12 = vld [vmem:[%s5225_s3 + $0x28] sm:$0xff] (!%p327_p2)   ;;  %vm1734_vm4 = vcmask (!%p327_p2), 1044480   ;;  %vm4038_vm5 = vmmov (!%p327_p2), 1   ;;  %s3010_s15 = sshll.u32 (!%p327_p2), %s3001_s14, 2 }
   0x9   : > { %v3775_v13 = vld [vmem:[%s5225_s3 + $0x70] sm:$0xff] (!%p327_p2)   ;;  %v3777_v15 = vld [vmem:[%s5225_s3 + $0x78] sm:$0xff] (!%p327_p2)   ;;  %v3815_v19 = vld [vmem:[%s5227_s5] ss:$8 sps:$4 sm:$0xff] (!%p327_p2)   ;;  %p385_p4 = scmp.lt.s32.totalorder (!%p327_p2), %s3010_s15, 7  ;;  %vm2934_vm7 = vcmask (!%p327_p2), 8192  }
   0xa   : > { %v3776_v14 = vld [vmem:[%s5225_s3 + $0x30] sm:$0xff] (!%p327_p2)   ;;  %v3778_v16 = vld [vmem:[%s5225_s3 + $0x38] sm:$0xff] (!%p327_p2)   ;;  %v3817_v20 = vld [vmem:[%s5227_s5 + $0x4] ss:$8 sps:$4 sm:$0xff] (!%p327_p2)  }
   0xb   : > { %3154 = vmatpush3.bf16.msra.mxu1 (!%p327_p2), %v3766_v3  ;;  %v3820_v21 = vld [vmem:[%s5227_s5 + $0x14] ss:$8 sps:$4 sm:$0xff] (!%p327_p2)   ;;  %v3818_v22 = vld [vmem:[%s5227_s5 + $0x10] ss:$8 sps:$4 sm:$0xff] (!%p327_p2)   ;;  %v3823_v23 = vld [vmem:[%s5227_s5 + $0x24] ss:$8 sps:$4 sm:$0xff] (!%p327_p2)  }
   0xc   : > { %3155 = vmatprep.subr.bf16.mxu1 (!%p327_p2), %v3767_v4  ;;  %v3821_v26 = vld [vmem:[%s5227_s5 + $0x20] ss:$8 sps:$4 sm:$0xff] (!%p327_p2)   ;;  %v3826_v27 = vld [vmem:[%s5227_s5 + $0x34] ss:$8 sps:$4 sm:$0xff] (!%p327_p2)   ;;  %v3824_v28 = vld [vmem:[%s5227_s5 + $0x30] ss:$8 sps:$4 sm:$0xff] (!%p327_p2)  }
   0xd   : > { %s5236_s17 = smov (!%p371_p3, %s370_s17), 47  ;;  %v3829_v29 = vld [vmem:[%s5227_s5 + $0x44] ss:$8 sps:$4 sm:$0xff]   ;;  %v3827_v32 = vld [vmem:[%s5227_s5 + $0x40] ss:$8 sps:$4 sm:$0xff]   ;;  %vm4569_vm6 = vmpackc.low %vm1734_vm4, %vm4038_vm5  ;;  %s5238_s15 = smov (!%p385_p4, %s3010_s15), 7 }
   0xe   : > { %s3149_s12 = sshll.u32 %s5236_s17, 3  ;;  %v3832_v33 = vld [vmem:[%s5227_s5 + $0x54] ss:$8 sps:$4 sm:$0xff]   ;;  %v3830_v34 = vld [vmem:[%s5227_s5 + $0x50] ss:$8 sps:$4 sm:$0xff]   ;;  %s387_s22 = scalar_lea.vmem %s5232_s10, %s5238_s15 }
   0xf   : > { %3156 = vmatpush3.bf16.msra.mxu1 %v3768_v5  ;;  %s4140_s20 = scalar_lea.vmem %s5222_s0, %s3149_s12  ;;  %v3835_v35 = vld [vmem:[%s5227_s5 + $0x64] ss:$8 sps:$4 sm:$0xff]   ;;  %v3833_v38 = vld [vmem:[%s5227_s5 + $0x60] ss:$8 sps:$4 sm:$0xff]   ;;  %v3838_v39 = vld [vmem:[%s5227_s5 + $0x74] ss:$8 sps:$4 sm:$0xff]   ;;  %s4228_s26 = scalar_lea.vmem %s5223_s1, %s3149_s12 }
  0x10   : > { %3157 = vmatprep.subr.bf16.mxu1 %v3769_v6  ;;  %v3781_v11 = vld [vmem:[%s4140_s20 + $0x4] ss:$8 sps:$4 sm:$0xff]   ;;  %v3779_v17 = vld [vmem:[%s4140_s20] ss:$8 sps:$4 sm:$0xff]   ;;  %v3782_v18 = vld [vmem:[%s4140_s20 + $0x14] ss:$8 sps:$4 sm:$0xff]  }
  0x11   : > { %701 = vmatprep.mubr.bf16.mxu1 %v3781_v11  ;;  %v3784_v24 = vld [vmem:[%s4140_s20 + $0x10] ss:$8 sps:$4 sm:$0xff]   ;;  %v3785_v25 = vld [vmem:[%s4140_s20 + $0x24] ss:$8 sps:$4 sm:$0xff]   ;;  %v3787_v30 = vld [vmem:[%s4140_s20 + $0x20] ss:$8 sps:$4 sm:$0xff]  }
  0x12   : > { %v3788_v31 = vld [vmem:[%s4140_s20 + $0x34] ss:$8 sps:$4 sm:$0xff]   ;;  %v3790_v36 = vld [vmem:[%s4140_s20 + $0x30] ss:$8 sps:$4 sm:$0xff]   ;;  %v3791_v37 = vld [vmem:[%s4140_s20 + $0x44] ss:$8 sps:$4 sm:$0xff]  }
  0x13   : > { %3158 = vmatpush3.bf16.msra.mxu1 %v3770_v7  ;;  %v3836_v40 = vld [vmem:[%s5227_s5 + $0x70] ss:$8 sps:$4 sm:$0xff]   ;;  %v3841_v41 = vld [vmem:[%s5227_s5 + $0x84] ss:$8 sps:$4 sm:$0xff]   ;;  %v3793_v42 = vld [vmem:[%s4140_s20 + $0x40] ss:$8 sps:$4 sm:$0xff]  }
  0x14   : > { %3159 = vmatprep.subr.bf16.mxu1 %v3771_v8  ;;  %v3794_v43 = vld [vmem:[%s4140_s20 + $0x54] ss:$8 sps:$4 sm:$0xff]   ;;  %v3839_v44 = vld [vmem:[%s5227_s5 + $0x80] ss:$8 sps:$4 sm:$0xff]   ;;  %v3842_v46 = vld [vmem:[%s5227_s5 + $0x90] ss:$8 sps:$4 sm:$0xff]  }
  0x15   : > { %v3844_v45 = vld [vmem:[%s5227_s5 + $0x94] ss:$8 sps:$4 sm:$0xff]   ;;  %v3847_v47 = vld [vmem:[%s5227_s5 + $0xa4] ss:$8 sps:$4 sm:$0xff]   ;;  %v3796_v48 = vld [vmem:[%s4140_s20 + $0x50] ss:$8 sps:$4 sm:$0xff]  }
  0x16   : > { %v3797_v49 = vld [vmem:[%s4140_s20 + $0x64] ss:$8 sps:$4 sm:$0xff]   ;;  %v3845_v50 = vld [vmem:[%s5227_s5 + $0xa0] ss:$8 sps:$4 sm:$0xff]   ;;  %v3850_v51 = vld [vmem:[%s5227_s5 + $0xb4] ss:$8 sps:$4 sm:$0xff]  }
  0x17   : > { %3160 = vmatpush3.bf16.msra.mxu1 %v3772_v9  ;;  %v3848_v52 = vld [vmem:[%s5227_s5 + $0xb0] ss:$8 sps:$4 sm:$0xff]   ;;  %v3799_v53 = vld [vmem:[%s4140_s20 + $0x60] ss:$8 sps:$4 sm:$0xff]   ;;  %v3800_v54 = vld [vmem:[%s4140_s20 + $0x74] ss:$8 sps:$4 sm:$0xff]  }
  0x18   : > { %3161 = vmatprep.subr.bf16.mxu1 %v3773_v10  ;;  %v3802_v55 = vld [vmem:[%s4140_s20 + $0x70] ss:$8 sps:$4 sm:$0xff]   ;;  %v3803_v56 = vld [vmem:[%s4140_s20 + $0x84] ss:$8 sps:$4 sm:$0xff]   ;;  %v3805_v57 = vld [vmem:[%s4140_s20 + $0x80] ss:$8 sps:$4 sm:$0xff]  }
  0x19   : > { %v3806_v58 = vld [vmem:[%s4140_s20 + $0x94] ss:$8 sps:$4 sm:$0xff]   ;;  %v3808_v59 = vld [vmem:[%s4140_s20 + $0x90] ss:$8 sps:$4 sm:$0xff]   ;;  %v3809_v60 = vld [vmem:[%s4140_s20 + $0xa4] ss:$8 sps:$4 sm:$0xff]  }
  0x1a   : > { %v3811_v61 = vld [vmem:[%s4140_s20 + $0xa0] ss:$8 sps:$4 sm:$0xff]   ;;  %v3812_v62 = vld [vmem:[%s4140_s20 + $0xb4] ss:$8 sps:$4 sm:$0xff]   ;;  %v3814_v63 = vld [vmem:[%s4140_s20 + $0xb0] ss:$8 sps:$4 sm:$0xff]  }
  0x1b   : > { %3162 = vmatpush3.bf16.msra.mxu1 %v3774_v12  ;;  %v3853_v0 = vld [vmem:[%s5227_s5 + $0xc4] ss:$8 sps:$4 sm:$0xff]   ;;  %v3851_v1 = vld [vmem:[%s5227_s5 + $0xc0] ss:$8 sps:$4 sm:$0xff]   ;;  %v3856_v2 = vld [vmem:[%s5227_s5 + $0xd4] ss:$8 sps:$4 sm:$0xff]  }
  0x1c   : > { %3163 = vmatprep.subr.bf16.mxu1 %v3775_v13  ;;  %v3854_v3 = vld [vmem:[%s5227_s5 + $0xd0] ss:$8 sps:$4 sm:$0xff]   ;;  %v3859_v4 = vld [vmem:[%s5227_s5 + $0xe4] ss:$8 sps:$4 sm:$0xff]   ;;  %v3857_v5 = vld [vmem:[%s5227_s5 + $0xe0] ss:$8 sps:$4 sm:$0xff]  }
  0x1d   : > { %v3862_v6 = vld [vmem:[%s5227_s5 + $0xf4] ss:$8 sps:$4 sm:$0xff]   ;;  %v3860_v7 = vld [vmem:[%s5227_s5 + $0xf0] ss:$8 sps:$4 sm:$0xff]   ;;  %v3865_v8 = vld [vmem:[%s5227_s5 + $0x104] ss:$8 sps:$4 sm:$0xff]  }
  0x1e   : > { %v4296_v13 = vld [vmem:[%s5226_s4] ss:$0 sm:$0xff] }
  0x1f   : > { %3164 = vmatpush3.bf16.msra.mxu1 %v3776_v14 }
  0x20   : > { %3165 = vmatprep.subr.bf16.mxu1 %v3777_v15 }
  0x23   : > { %3166 = vmatpush3.bf16.msra.mxu1 %v3778_v16 }
  0x24   : > { %1422 = vmatprep.subr.bf16.mxu1 %v3817_v20 }
  0x26   : > { %702 = vmatmul.mubr.bf16.vlgmr.msra.gmra.mrb[0].mxu1 %v3779_v17 }
  0x27   : > { %709 = vmatprep.mubr.bf16.mxu1 %v3782_v18  ;;  %1423 = vmatpush1.bf16.msra.mxu1 %v3815_v19 }
  0x28   : > { %1424 = vmatprep.subr.bf16.mxu1 %v3820_v21 }
  0x2b   : > { %1425 = vmatpush1.bf16.msra.mxu1 %v3818_v22 }
  0x2c   : > { %1426 = vmatprep.subr.bf16.mxu1 %v3823_v23 }
  0x2e   : > { %710 = vmatmul.mubr.bf16.gmra.mrb[4].mxu1 %v3784_v24 }
  0x2f   : > { %717 = vmatprep.mubr.bf16.mxu1 %v3785_v25  ;;  %1427 = vmatpush1.bf16.msra.mxu1 %v3821_v26 }
  0x30   : > { %1428 = vmatprep.subr.bf16.mxu1 %v3826_v27 }
  0x33   : > { %1429 = vmatpush1.bf16.msra.mxu1 %v3824_v28 }
  0x34   : > { %1430 = vmatprep.subr.bf16.mxu1 %v3829_v29 }
  0x36   : > { %718 = vmatmul.mubr.bf16.gmra.mrb[8].mxu1 %v3787_v30 }
  0x37   : > { %725 = vmatprep.mubr.bf16.mxu1 %v3788_v31  ;;  %1431 = vmatpush1.bf16.msra.mxu1 %v3827_v32 }
  0x38   : > { %1432 = vmatprep.subr.bf16.mxu1 %v3832_v33 }
  0x3b   : > { %1433 = vmatpush1.bf16.msra.mxu1 %v3830_v34 }
  0x3c   : > { %1434 = vmatprep.subr.bf16.mxu1 %v3835_v35 }
  0x3e   : > { %726 = vmatmul.mubr.bf16.gmra.mrb[12].mxu1 %v3790_v36 }
  0x3f   : > { %733 = vmatprep.mubr.bf16.mxu1 %v3791_v37  ;;  %1435 = vmatpush1.bf16.msra.mxu1 %v3833_v38 }
  0x40   : > { %1436 = vmatprep.subr.bf16.mxu1 %v3838_v39 }
  0x43   : > { %1437 = vmatpush1.bf16.msra.mxu1 %v3836_v40 }
  0x44   : > { %1438 = vmatprep.subr.bf16.mxu1 %v3841_v41 }
  0x46   : > { %734 = vmatmul.mubr.bf16.gmra.mrb[16].mxu1 %v3793_v42 }
  0x47   : > { %741 = vmatprep.mubr.bf16.mxu1 %v3794_v43  ;;  %1439 = vmatpush1.bf16.msra.mxu1 %v3839_v44 }
  0x48   : > { %1440 = vmatprep.subr.bf16.mxu1 %v3844_v45 }
  0x4b   : > { %1441 = vmatpush1.bf16.msra.mxu1 %v3842_v46 }
  0x4c   : > { %1442 = vmatprep.subr.bf16.mxu1 %v3847_v47  ;;  %v3863_v47 = vld [vmem:[%s5227_s5 + $0x100] ss:$8 sps:$4 sm:$0xff]  }
  0x4e   : > { %742 = vmatmul.mubr.bf16.gmra.mrb[20].mxu1 %v3796_v48 }
  0x4f   : > { %749 = vmatprep.mubr.bf16.mxu1 %v3797_v49  ;;  %1443 = vmatpush1.bf16.msra.mxu1 %v3845_v50 }
  0x50   : > { %1444 = vmatprep.subr.bf16.mxu1 %v3850_v51 }
  0x53   : > { %1445 = vmatpush1.bf16.msra.mxu1 %v3848_v52 }
  0x54   : > { %1446 = vmatprep.subr.bf16.mxu1 %v3853_v0  ;;  %v3871_v0 = vld [vmem:[%s5227_s5 + $0x124] ss:$8 sps:$4 sm:$0xff]  }
  0x56   : > { %750 = vmatmul.mubr.bf16.gmra.mrb[24].mxu1 %v3799_v53  ;;  %v3868_v53 = vld [vmem:[%s5227_s5 + $0x114] ss:$8 sps:$4 sm:$0xff]  }
  0x57   : > { %757 = vmatprep.mubr.bf16.mxu1 %v3800_v54  ;;  %1447 = vmatpush1.bf16.msra.mxu1 %v3851_v1 }
  0x58   : > { %1448 = vmatprep.subr.bf16.mxu1 %v3856_v2 }
  0x5b   : > { %1449 = vmatpush1.bf16.msra.mxu1 %v3854_v3 }
  0x5c   : > { %1450 = vmatprep.subr.bf16.mxu1 %v3859_v4 }
  0x5e   : > { %758 = vmatmul.mubr.bf16.gmra.mrb[28].mxu1 %v3802_v55 }
  0x5f   : > { %765 = vmatprep.mubr.bf16.mxu1 %v3803_v56  ;;  %1451 = vmatpush1.bf16.msra.mxu1 %v3857_v5 }
  0x60   : > { %1452 = vmatprep.subr.bf16.mxu1 %v3862_v6 }
  0x63   : > { %1453 = vmatpush1.bf16.msra.mxu1 %v3860_v7  ;;  %v3869_v7 = vld [vmem:[%s5227_s5 + $0x120] ss:$8 sps:$4 sm:$0xff]  }
  0x64   : > { %1575 = vmatprep.subr.bf16.mxu1 %v3865_v8 }
  0x66   : > { %766 = vmatmul.mubr.bf16.gmra.mrb[32].mxu1 %v3805_v57 }
  0x67   : > { %773 = vmatprep.mubr.bf16.mxu1 %v3806_v58  ;;  %v3866_v58 = vld [vmem:[%s5227_s5 + $0x110] ss:$8 sps:$4 sm:$0xff]  }
  0x6e   : > { %774 = vmatmul.mubr.bf16.gmra.mrb[36].mxu1 %v3808_v59 }
  0x6f   : > { %781 = vmatprep.mubr.bf16.mxu1 %v3809_v60 }
  0x76   : > { %782 = vmatmul.mubr.bf16.gmra.mrb[40].mxu1 %v3811_v61 }
  0x77   : > { %789 = vmatprep.mubr.bf16.mxu1 %v3812_v62 }
  0x7e   : > { %790 = vmatmul.mubr.bf16.gmra.mrb[44].mxu1 %v3814_v63 }
  0xf9   : > { %v3167_v9 = vpop.f32.mrb[0].mxu1 }
  0xfa   : > { %v3168_v10 = vpop.f32.mrb[1].mxu1 }
  0xfb   : > { %v3169_v11 = vadd.f32 %v3168_v10, %v3167_v9  ;;  %v3170_v12 = vpop.f32.mrb[2].mxu1 }
  0xfc   : > { %v3171_v14 = vpop.f32.mrb[3].mxu1 }
  0xfd   : > { %v3172_v15 = vadd.f32 %v3171_v14, %v3170_v12  ;;  %v704_v16 = vadd.f32 %v3169_v11, %v4296_v13  ;;  %v3874_v14 = vld [vmem:[%s5227_s5 + $0x134] ss:$8 sps:$4 sm:$0xff]  }
  0xff   : > { %v707_v17 = vadd.f32 %v3172_v15, %v4296_v13 }
 0x101   : > { %v798_v18 = vpack.c.bf16 %v707_v17, %v704_v16  ;;  %v3173_v19 = vpop.f32.mrb[4].mxu1 }
 0x102   : > { %v3174_v20 = vpop.f32.mrb[5].mxu1 }
 0x103   : > { %v3175_v21 = vadd.f32 %v3174_v20, %v3173_v19  ;;  %v3176_v22 = vpop.f32.mrb[6].mxu1  ;;  %v812_v23 = vshrl.u32 %v798_v18, 16  ;;  %v814_v24 = vshll.u32 %v798_v18, 16  ;;  %v931_v42 = vrot.slane %v798_v18, 1  ;;  %v3872_v19 = vld [vmem:[%s5227_s5 + $0x130] ss:$8 sps:$4 sm:$0xff]  }
 0x104   : > { %v3177_v25 = vpop.f32.mrb[7].mxu1 }
 0x105   : > { %v3178_v26 = vadd.f32 %v3177_v25, %v3176_v22  ;;  %v967_v27 = vrot.slane %v812_v23, 1  ;;  %v968_v28 = vrot.slane %v814_v24, 2  ;;  %v712_v29 = vadd.f32 %v3175_v21, %v4296_v13  ;;  %v3877_v25 = vld [vmem:[%s5227_s5 + $0x144] ss:$8 sps:$4 sm:$0xff]  }
 0x106   : > { %v816_v34 = vrot.slane %v814_v24, 1 }
 0x107   : > { %v715_v30 = vadd.f32 %v3178_v26, %v4296_v13  ;;  %v969_v31 = vor.u32 %v968_v28, %v967_v27 }
 0x108   : > { %v817_v44 = vor.u32 %v816_v34, %v812_v23 }
 0x109   : > { %v799_v32 = vpack.c.bf16 %v715_v30, %v712_v29  ;;  %v3179_v33 = vpop.f32.mrb[8].mxu1 }
 0x10a   : > { %v3180_v35 = vpop.f32.mrb[9].mxu1 }
 0x10b   : > { %v3181_v36 = vadd.f32 %v3180_v35, %v3179_v33  ;;  %v3182_v37 = vpop.f32.mrb[10].mxu1  ;;  %v819_v38 = vshll.u32 %v799_v32, 16  ;;  %v823_v39 = vshrl.u32 %v799_v32, 16  ;;  %v932_v40 = vrot.slane %v799_v32, 1 }
 0x10c   : > { %v3183_v41 = vpop.f32.mrb[11].mxu1 }
 0x10d   : > { %v3184_v43 = vadd.f32 %v3183_v41, %v3182_v37  ;;  %v821_v45 = vrot.slane %v819_v38, 1  ;;  %v970_v46 = vrot.slane %v823_v39, 1  ;;  %v971_v48 = vrot.slane %v819_v38, 2  ;;  %v3880_v38 = vld [vmem:[%s5227_s5 + $0x154] ss:$8 sps:$4 sm:$0xff]  }
 0x10e   : > { %v4306_v49 = vsel %vm930_vm0, %v931_v42, %v932_v40  ;;  %v720_v50 = vadd.f32 %v3181_v36, %v4296_v13 }
 0x10f   : > { %v723_v51 = vadd.f32 %v3184_v43, %v4296_v13  ;;  %v822_v52 = vsel %vm810_vm1, %v817_v44, %v821_v45  ;;  %v972_v54 = vor.u32 %v971_v48, %v970_v46  ;;  %v825_v4 = vor.u32 %v823_v39, %v821_v45  ;;  %v3878_v43 = vld [vmem:[%s5227_s5 + $0x150] ss:$8 sps:$4 sm:$0xff]  }
 0x110   : > { %1454 = vmatprep.mubr.bf16.mxu1 %v822_v52 }
 0x111   : > { %v800_v55 = vpack.c.bf16 %v723_v51, %v720_v50  ;;  %v3185_v56 = vpop.f32.mrb[12].mxu1  ;;  %1455 = vmatmul.mubr.bf16.vlgmr.msra.gmra.mrb[48].mxu1 %v798_v18  ;;  %v4318_v59 = vsel %vm966_vm2, %v969_v31, %v972_v54  ;;  %v3883_v50 = vld [vmem:[%s5227_s5 + $0x164] ss:$8 sps:$4 sm:$0xff]  }
 0x112   : > { %v3186_v57 = vpop.f32.mrb[13].mxu1  ;;  %1576 = vmatpush1.bf16.msra.mxu1 %v3863_v47 }
 0x113   : > { %v3187_v60 = vadd.f32 %v3186_v57, %v3185_v56  ;;  %v3188_v61 = vpop.f32.mrb[14].mxu1  ;;  %v827_v62 = vshll.u32 %v800_v55, 16  ;;  %1577 = vmatprep.subr.bf16.mxu1 %v3868_v53  ;;  %v831_v63 = vshrl.u32 %v800_v55, 16  ;;  %v934_v1 = vrot.slane %v800_v55, 1  ;;  %v3881_v57 = vld [vmem:[%s5227_s5 + $0x160] ss:$8 sps:$4 sm:$0xff]  }
 0x114   : > { %v3189_v2 = vpop.f32.mrb[15].mxu1 }
 0x115   : > { %v3190_v3 = vadd.f32 %v3189_v2, %v3188_v61  ;;  %v829_v5 = vrot.slane %v827_v62, 1  ;;  %v974_v6 = vrot.slane %v831_v63, 1  ;;  %v975_v8 = vrot.slane %v827_v62, 2 }
 0x116   : > { %1578 = vmatpush1.bf16.msra.mxu1 %v3866_v58  ;;  %v4327_v9 = vsel %vm930_vm0, %v932_v40, %v934_v1  ;;  %v728_v10 = vadd.f32 %v3187_v60, %v4296_v13 }
 0x117   : > { %v731_v11 = vadd.f32 %v3190_v3, %v4296_v13  ;;  %v830_v12 = vsel %vm810_vm1, %v825_v4, %v829_v5  ;;  %1579 = vmatprep.subr.bf16.mxu1 %v3871_v0  ;;  %v976_v15 = vor.u32 %v975_v8, %v974_v6  ;;  %v833_v29 = vor.u32 %v831_v63, %v829_v5  ;;  %v3886_v0 = vld [vmem:[%s5227_s5 + $0x174] ss:$8 sps:$4 sm:$0xff]   ;;  %v3884_v5 = vld [vmem:[%s5227_s5 + $0x170] ss:$8 sps:$4 sm:$0xff]  }
 0x118   : > { %1464 = vmatprep.mubr.bf16.mxu1 %v830_v12  ;;  %v3889_v12 = vld [vmem:[%s5227_s5 + $0x184] ss:$8 sps:$4 sm:$0xff]  }
 0x119   : > { %v801_v16 = vpack.c.bf16 %v731_v11, %v728_v10  ;;  %v3191_v17 = vpop.f32.mrb[16].mxu1  ;;  %1465 = vmatmul.mubr.bf16.gmra.mrb[52].mxu1 %v799_v32  ;;  %v4339_v20 = vsel %vm966_vm2, %v972_v54, %v976_v15  ;;  %v3875_v32 = vld [vmem:[%s5227_s5 + $0x140] ss:$8 sps:$4 sm:$0xff]  }
 0x11a   : > { %v3192_v18 = vpop.f32.mrb[17].mxu1  ;;  %1580 = vmatpush1.bf16.msra.mxu1 %v3869_v7 }
 0x11b   : > { %v3193_v21 = vadd.f32 %v3192_v18, %v3191_v17  ;;  %v3194_v22 = vpop.f32.mrb[18].mxu1  ;;  %v835_v23 = vshll.u32 %v801_v16, 16  ;;  %1581 = vmatprep.subr.bf16.mxu1 %v3874_v14  ;;  %v839_v24 = vshrl.u32 %v801_v16, 16  ;;  %v936_v26 = vrot.slane %v801_v16, 1 }
 0x11c   : > { %v3195_v27 = vpop.f32.mrb[19].mxu1 }
 0x11d   : > { %v3196_v28 = vadd.f32 %v3195_v27, %v3194_v22  ;;  %v837_v30 = vrot.slane %v835_v23, 1  ;;  %v978_v31 = vrot.slane %v839_v24, 1  ;;  %v979_v33 = vrot.slane %v835_v23, 2  ;;  %v3892_v27 = vld [vmem:[%s5227_s5 + $0x194] ss:$8 sps:$4 sm:$0xff]  }
 0x11e   : > { %1582 = vmatpush1.bf16.msra.mxu1 %v3872_v19  ;;  %v4348_v34 = vsel %vm930_vm0, %v934_v1, %v936_v26  ;;  %v736_v35 = vadd.f32 %v3193_v21, %v4296_v13  ;;  %v3887_v21 = vld [vmem:[%s5227_s5 + $0x180] ss:$8 sps:$4 sm:$0xff]  }
 0x11f   : > { %v739_v36 = vadd.f32 %v3196_v28, %v4296_v13  ;;  %v838_v37 = vsel %vm810_vm1, %v833_v29, %v837_v30  ;;  %1583 = vmatprep.subr.bf16.mxu1 %v3877_v25  ;;  %v980_v39 = vor.u32 %v979_v33, %v978_v31  ;;  %v841_v54 = vor.u32 %v839_v24, %v837_v30 }
 0x120   : > { %1474 = vmatprep.mubr.bf16.mxu1 %v838_v37 }
 0x121   : > { %v802_v40 = vpack.c.bf16 %v739_v36, %v736_v35  ;;  %v3197_v41 = vpop.f32.mrb[20].mxu1  ;;  %1475 = vmatmul.mubr.bf16.gmra.mrb[56].mxu1 %v800_v55  ;;  %v4360_v44 = vsel %vm966_vm2, %v976_v15, %v980_v39 }
 0x122   : > { %v3198_v42 = vpop.f32.mrb[21].mxu1  ;;  %1584 = vmatpush1.bf16.msra.mxu1 %v3875_v32  ;;  %v3890_v32 = vld [vmem:[%s5227_s5 + $0x190] ss:$8 sps:$4 sm:$0xff]  }
 0x123   : > { %v3199_v45 = vadd.f32 %v3198_v42, %v3197_v41  ;;  %v3200_v46 = vpop.f32.mrb[22].mxu1  ;;  %v843_v47 = vshll.u32 %v802_v40, 16  ;;  %v847_v48 = vshrl.u32 %v802_v40, 16  ;;  %1585 = vmatprep.subr.bf16.mxu1 %v3880_v38  ;;  %v938_v51 = vrot.slane %v802_v40, 1 }
 0x124   : > { %v3201_v52 = vpop.f32.mrb[23].mxu1 }
 0x125   : > { %v3202_v53 = vadd.f32 %v3201_v52, %v3200_v46  ;;  %v845_v55 = vrot.slane %v843_v47, 1  ;;  %v982_v56 = vrot.slane %v847_v48, 1  ;;  %v983_v58 = vrot.slane %v843_v47, 2  ;;  %v3893_v47 = vld [vmem:[%s5227_s5 + $0x1a0] ss:$8 sps:$4 sm:$0xff]  }
 0x126   : > { %1586 = vmatpush1.bf16.msra.mxu1 %v3878_v43  ;;  %v4369_v60 = vsel %vm930_vm0, %v936_v26, %v938_v51  ;;  %v744_v61 = vadd.f32 %v3199_v45, %v4296_v13 }
 0x127   : > { %v747_v62 = vadd.f32 %v3202_v53, %v4296_v13  ;;  %v846_v63 = vsel %vm810_vm1, %v841_v54, %v845_v55  ;;  %1587 = vmatprep.subr.bf16.mxu1 %v3883_v50  ;;  %v984_v1 = vor.u32 %v983_v58, %v982_v56  ;;  %v849_v17 = vor.u32 %v847_v48, %v845_v55  ;;  %v3898_v54 = vld [vmem:[%s5227_s5 + $0x1b4] ss:$8 sps:$4 sm:$0xff]  }
 0x128   : > { %1484 = vmatprep.mubr.bf16.mxu1 %v846_v63 }
 0x129   : > { %v803_v2 = vpack.c.bf16 %v747_v62, %v744_v61  ;;  %v3203_v3 = vpop.f32.mrb[24].mxu1  ;;  %1485 = vmatmul.mubr.bf16.gmra.mrb[60].mxu1 %v801_v16  ;;  %v4381_v6 = vsel %vm966_vm2, %v980_v39, %v984_v1  ;;  %v3895_v39 = vld [vmem:[%s5227_s5 + $0x1a4] ss:$8 sps:$4 sm:$0xff]   ;;  %v3896_v61 = vld [vmem:[%s5227_s5 + $0x1b0] ss:$8 sps:$4 sm:$0xff]  }
 0x12a   : > { %v3204_v4 = vpop.f32.mrb[25].mxu1  ;;  %1588 = vmatpush1.bf16.msra.mxu1 %v3881_v57 }
 0x12b   : > { %v3205_v7 = vadd.f32 %v3204_v4, %v3203_v3  ;;  %v3206_v8 = vpop.f32.mrb[26].mxu1  ;;  %v851_v10 = vshll.u32 %v803_v2, 16  ;;  %v855_v11 = vshrl.u32 %v803_v2, 16  ;;  %1589 = vmatprep.subr.bf16.mxu1 %v3886_v0  ;;  %v940_v14 = vrot.slane %v803_v2, 1  ;;  %v3901_v4 = vld [vmem:[%s5227_s5 + $0x1c4] ss:$8 sps:$4 sm:$0xff]  }
 0x12c   : > { %v3207_v15 = vpop.f32.mrb[27].mxu1 }
 0x12d   : > { %v3208_v16 = vadd.f32 %v3207_v15, %v3206_v8  ;;  %v853_v18 = vrot.slane %v851_v10, 1  ;;  %v986_v19 = vrot.slane %v855_v11, 1  ;;  %v987_v22 = vrot.slane %v851_v10, 2 }
 0x12e   : > { %1590 = vmatpush1.bf16.msra.mxu1 %v3884_v5  ;;  %v4390_v23 = vsel %vm930_vm0, %v938_v51, %v940_v14  ;;  %v752_v24 = vadd.f32 %v3205_v7, %v4296_v13 }
 0x12f   : > { %v755_v25 = vadd.f32 %v3208_v16, %v4296_v13  ;;  %v854_v26 = vsel %vm810_vm1, %v849_v17, %v853_v18  ;;  %1591 = vmatprep.subr.bf16.mxu1 %v3889_v12  ;;  %v988_v28 = vor.u32 %v987_v22, %v986_v19  ;;  %v857_v43 = vor.u32 %v855_v11, %v853_v18  ;;  %v3899_v12 = vld [vmem:[%s5227_s5 + $0x1c0] ss:$8 sps:$4 sm:$0xff]   ;;  %v3904_v19 = vld [vmem:[%s5227_s5 + $0x1d4] ss:$8 sps:$4 sm:$0xff]  }
 0x130   : > { %1494 = vmatprep.mubr.bf16.mxu1 %v854_v26  ;;  %v3902_v26 = vld [vmem:[%s5227_s5 + $0x1d0] ss:$8 sps:$4 sm:$0xff]  }
 0x131   : > { %v804_v29 = vpack.c.bf16 %v755_v25, %v752_v24  ;;  %v3209_v30 = vpop.f32.mrb[28].mxu1  ;;  %1495 = vmatmul.mubr.bf16.gmra.mrb[64].mxu1 %v802_v40  ;;  %v4402_v33 = vsel %vm966_vm2, %v984_v1, %v988_v28 }
 0x132   : > { %v3210_v31 = vpop.f32.mrb[29].mxu1  ;;  %1592 = vmatpush1.bf16.msra.mxu1 %v3887_v21 }
 0x133   : > { %v3211_v35 = vadd.f32 %v3210_v31, %v3209_v30  ;;  %v3212_v36 = vpop.f32.mrb[30].mxu1  ;;  %v859_v37 = vshll.u32 %v804_v29, 16  ;;  %v863_v38 = vshrl.u32 %v804_v29, 16  ;;  %1593 = vmatprep.subr.bf16.mxu1 %v3892_v27  ;;  %v942_v41 = vrot.slane %v804_v29, 1 }
 0x134   : > { %v3213_v40 = vpop.f32.mrb[31].mxu1 }
 0x135   : > { %v3214_v42 = vadd.f32 %v3213_v40, %v3212_v36  ;;  %v861_v45 = vrot.slane %v859_v37, 1  ;;  %v990_v46 = vrot.slane %v863_v38, 1  ;;  %v991_v48 = vrot.slane %v859_v37, 2  ;;  %v3905_v40 = vld [vmem:[%s5227_s5 + $0x1e0] ss:$8 sps:$4 sm:$0xff]  }
 0x136   : > { %1594 = vmatpush1.bf16.msra.mxu1 %v3890_v32  ;;  %v4411_v50 = vsel %vm930_vm0, %v940_v14, %v942_v41  ;;  %v760_v51 = vadd.f32 %v3211_v35, %v4296_v13  ;;  %v3907_v35 = vld [vmem:[%s5227_s5 + $0x1e4] ss:$8 sps:$4 sm:$0xff]  }
 0x137   : > { %v763_v52 = vadd.f32 %v3214_v42, %v4296_v13  ;;  %v862_v53 = vsel %vm810_vm1, %v857_v43, %v861_v45  ;;  %1595 = vmatprep.subr.bf16.mxu1 %v3895_v39  ;;  %v992_v55 = vor.u32 %v991_v48, %v990_v46  ;;  %v865_v8 = vor.u32 %v863_v38, %v861_v45  ;;  %v3910_v48 = vld [vmem:[%s5227_s5 + $0x1f4] ss:$8 sps:$4 sm:$0xff]  }
 0x138   : > { %1504 = vmatprep.mubr.bf16.mxu1 %v862_v53 }
 0x139   : > { %v805_v56 = vpack.c.bf16 %v763_v52, %v760_v51  ;;  %v3215_v57 = vpop.f32.mrb[32].mxu1  ;;  %1505 = vmatmul.mubr.bf16.gmra.mrb[68].mxu1 %v803_v2  ;;  %v4423_v62 = vsel %vm966_vm2, %v988_v28, %v992_v55 }
 0x13a   : > { %v3216_v58 = vpop.f32.mrb[33].mxu1  ;;  %1596 = vmatpush1.bf16.msra.mxu1 %v3893_v47 }
 0x13b   : > { %v3217_v63 = vadd.f32 %v3216_v58, %v3215_v57  ;;  %v3218_v0 = vpop.f32.mrb[34].mxu1  ;;  %v867_v1 = vshll.u32 %v805_v56, 16  ;;  %v871_v3 = vshrl.u32 %v805_v56, 16  ;;  %1597 = vmatprep.subr.bf16.mxu1 %v3898_v54  ;;  %v944_v5 = vrot.slane %v805_v56, 1 }
 0x13c   : > { %v3219_v2 = vpop.f32.mrb[35].mxu1 }
 0x13d   : > { %v3220_v7 = vadd.f32 %v3219_v2, %v3218_v0  ;;  %v869_v10 = vrot.slane %v867_v1, 1  ;;  %v994_v11 = vrot.slane %v871_v3, 1  ;;  %v995_v14 = vrot.slane %v867_v1, 2 }
 0x13e   : > { %1598 = vmatpush1.bf16.msra.mxu1 %v3896_v61  ;;  %v4432_v15 = vsel %vm930_vm0, %v942_v41, %v944_v5  ;;  %v768_v16 = vadd.f32 %v3217_v63, %v4296_v13 }
 0x13f   : > { %v771_v17 = vadd.f32 %v3220_v7, %v4296_v13  ;;  %v870_v18 = vsel %vm810_vm1, %v865_v8, %v869_v10  ;;  %1599 = vmatprep.subr.bf16.mxu1 %v3901_v4  ;;  %v996_v21 = vor.u32 %v995_v14, %v994_v11  ;;  %v873_v38 = vor.u32 %v871_v3, %v869_v10 }
 0x140   : > { %1514 = vmatprep.mubr.bf16.mxu1 %v870_v18 }
 0x141   : > { %v806_v22 = vpack.c.bf16 %v771_v17, %v768_v16  ;;  %v3221_v24 = vpop.f32.mrb[36].mxu1  ;;  %1515 = vmatmul.mubr.bf16.gmra.mrb[72].mxu1 %v804_v29  ;;  %v4444_v27 = vsel %vm966_vm2, %v992_v55, %v996_v21  ;;  %v3908_v55 = vld [vmem:[%s5227_s5 + $0x1f0] ss:$8 sps:$4 sm:$0xff]  }
 0x142   : > { %v3222_v25 = vpop.f32.mrb[37].mxu1  ;;  %1600 = vmatpush1.bf16.msra.mxu1 %v3899_v12 }
 0x143   : > { %v3223_v28 = vadd.f32 %v3222_v25, %v3221_v24  ;;  %v3224_v30 = vpop.f32.mrb[38].mxu1  ;;  %v875_v31 = vshll.u32 %v806_v22, 16  ;;  %v879_v32 = vshrl.u32 %v806_v22, 16  ;;  %1601 = vmatprep.subr.bf16.mxu1 %v3904_v19  ;;  %v946_v36 = vrot.slane %v806_v22, 1 }
 0x144   : > { %v3225_v29 = vpop.f32.mrb[39].mxu1 }
 0x145   : > { %v3226_v37 = vadd.f32 %v3225_v29, %v3224_v30  ;;  %v877_v39 = vrot.slane %v875_v31, 1  ;;  %v998_v41 = vrot.slane %v879_v32, 1  ;;  %v999_v42 = vrot.slane %v875_v31, 2 }
 0x146   : > { %1602 = vmatpush1.bf16.msra.mxu1 %v3902_v26  ;;  %v4453_v43 = vsel %vm930_vm0, %v944_v5, %v946_v36  ;;  %v776_v45 = vadd.f32 %v3223_v28, %v4296_v13 }
 0x147   : > { %v779_v46 = vadd.f32 %v3226_v37, %v4296_v13  ;;  %v878_v47 = vsel %vm810_vm1, %v873_v38, %v877_v39  ;;  %1603 = vmatprep.subr.bf16.mxu1 %v3907_v35  ;;  %v1000_v51 = vor.u32 %v999_v42, %v998_v41  ;;  %v881_v5 = vor.u32 %v879_v32, %v877_v39 }
 0x148   : > { %1524 = vmatprep.mubr.bf16.mxu1 %v878_v47 }
 0x149   : > { %v807_v52 = vpack.c.bf16 %v779_v46, %v776_v45  ;;  %v3227_v53 = vpop.f32.mrb[40].mxu1  ;;  %1525 = vmatmul.mubr.bf16.gmra.mrb[76].mxu1 %v805_v56  ;;  %v4465_v57 = vsel %vm966_vm2, %v996_v21, %v1000_v51 }
 0x14a   : > { %v3228_v54 = vpop.f32.mrb[41].mxu1  ;;  %1604 = vmatpush1.bf16.msra.mxu1 %v3905_v40 }
 0x14b   : > { %v3229_v58 = vadd.f32 %v3228_v54, %v3227_v53  ;;  %v3230_v61 = vpop.f32.mrb[42].mxu1  ;;  %v883_v63 = vshll.u32 %v807_v52, 16  ;;  %v887_v0 = vshrl.u32 %v807_v52, 16  ;;  %1605 = vmatprep.subr.bf16.mxu1 %v3910_v48  ;;  %v948_v1 = vrot.slane %v807_v52, 1 }
 0x14c   : > { %v3231_v3 = vpop.f32.mrb[43].mxu1 }
 0x14d   : > { %v3232_v4 = vadd.f32 %v3231_v3, %v3230_v61  ;;  %v885_v2 = vrot.slane %v883_v63, 1  ;;  %v1002_v56 = vrot.slane %v887_v0, 1  ;;  %v1003_v7 = vrot.slane %v883_v63, 2 }
 0x14e   : > { %1606 = vmatpush1.bf16.msra.mxu1 %v3908_v55  ;;  %v4468_v8 = vsel %vm930_vm0, %v946_v36, %v948_v1  ;;  %v784_v10 = vadd.f32 %v3229_v58, %v4296_v13 }
 0x14f   : > { %v787_v11 = vadd.f32 %v3232_v4, %v4296_v13  ;;  %v886_v12 = vsel %vm810_vm1, %v881_v5, %v885_v2  ;;  %v1004_v14 = vor.u32 %v1003_v7, %v1002_v56  ;;  %v889_v32 = vor.u32 %v887_v0, %v885_v2 }
 0x150   : > { %1534 = vmatprep.mubr.bf16.mxu1 %v886_v12 }
 0x151   : > { %v808_v16 = vpack.c.bf16 %v787_v11, %v784_v10  ;;  %v3233_v17 = vpop.f32.mrb[44].mxu1  ;;  %1535 = vmatmul.mubr.bf16.gmra.mrb[80].mxu1 %v806_v22  ;;  %v1005_v19 = vsel %vm966_vm2, %v1000_v51, %v1004_v14 }
 0x152   : > { %v3234_v18 = vpop.f32.mrb[45].mxu1 }
 0x153   : > { %v3235_v21 = vadd.f32 %v3234_v18, %v3233_v17  ;;  %v3236_v24 = vpop.f32.mrb[46].mxu1  ;;  %v891_v25 = vshll.u32 %v808_v16, 16  ;;  %v895_v26 = vshrl.u32 %v808_v16, 16  ;;  %v950_v28 = vrot.slane %v808_v16, 1 }
 0x154   : > { %v3237_v30 = vpop.f32.mrb[47].mxu1 }
 0x155   : > { %v3238_v31 = vadd.f32 %v3237_v30, %v3236_v24  ;;  %v893_v35 = vrot.slane %v891_v25, 1  ;;  %v1006_v36 = vrot.slane %v895_v26, 1  ;;  %v1007_v29 = vrot.slane %v891_v25, 2 }
 0x156   : > { %v951_v37 = vsel %vm930_vm0, %v948_v1, %v950_v28  ;;  %v792_v38 = vadd.f32 %v3235_v21, %v4296_v13 }
 0x157   : > { %v795_v22 = vadd.f32 %v3238_v31, %v4296_v13  ;;  %v894_v39 = vsel %vm810_vm1, %v889_v32, %v893_v35  ;;  %v1008_v41 = vor.u32 %v1007_v29, %v1006_v36  ;;  %v897_v48 = vor.u32 %v895_v26, %v893_v35 }
 0x158   : > { %1544 = vmatprep.mubr.bf16.mxu1 %v894_v39 }
 0x159   : > { %v809_v40 = vpack.c.bf16 %v795_v22, %v792_v38  ;;  %1545 = vmatmul.mubr.bf16.gmra.mrb[84].mxu1 %v807_v52  ;;  %v1009_v42 = vsel %vm966_vm2, %v1004_v14, %v1008_v41 }
 0x15b   : > { %v899_v45 = vshll.u32 %v809_v40, 16  ;;  %v903_v46 = vshrl.u32 %v809_v40, 16  ;;  %v952_v47 = vrot.slane %v809_v40, 1 }
 0x15d   : > { %v901_v51 = vrot.slane %v899_v45, 1  ;;  %v1010_v53 = vrot.slane %v903_v46, 1  ;;  %v1011_v54 = vrot.slane %v899_v45, 2  ;;  %v953_v55 = vsel %vm930_vm0, %v950_v28, %v952_v47 }
 0x15f   : > { %v902_v58 = vsel %vm810_vm1, %v897_v48, %v901_v51  ;;  %v905_v13 = vor.u32 %v903_v46, %v901_v51  ;;  %v1012_v61 = vor.u32 %v1011_v54, %v1010_v53 }
 0x160   : > { %1554 = vmatprep.mubr.bf16.mxu1 %v902_v58 }
 0x161   : > { %1555 = vmatmul.mubr.bf16.gmra.mrb[88].mxu1 %v808_v16  ;;  %v1013_v63 = vsel %vm966_vm2, %v1008_v41, %v1012_v61 }
 0x162   : > { %1564 = vmatprep.mubr.bf16.mxu1 %v905_v13 }
 0x169   : > { %1565 = vmatmul.mubr.bf16.gmra.mrb[92].mxu1 %v809_v40 }
 0x16a   : > { %1607 = vmatprep.mubr.bf16.mxu1 %v4318_v59 }
 0x171   : > { %1608 = vmatmul.mubr.bf16.vlgmr.msra.gmra.mrb[48].mxu1 %v4306_v49  ;;  %v4502_v49 = vld [vmem:[%s5224_s2] sm:$0xff] }
 0x172   : > { %1617 = vmatprep.mubr.bf16.mxu1 %v4339_v20  ;;  %v4506_v59 = vcombine.high %v4502_v49, %v4502_v49 }
 0x174   : > { %3118 = vmatprep.mubr.msk.f32.mxu0 %vm1731_vm3, %v4506_v59 }
 0x179   : > { %1618 = vmatmul.mubr.bf16.gmra.mrb[52].mxu1 %v4327_v9  ;;  %v1092_v9 = vlaneseq }
 0x17a   : > { %1627 = vmatprep.mubr.bf16.mxu1 %v4360_v44  ;;  %v1090_v44 = vld [vmem:[%s5228_s6] sm:$0x3] }
 0x17b   : > { %v4510_v20 = vshrl.u32 %v1092_v9, 7 }
 0x181   : > { %1628 = vmatmul.mubr.bf16.gmra.mrb[56].mxu1 %v4348_v34  ;;  %v1094_v34 = vsub.s32 0, %v4510_v20 }
 0x182   : > { %1637 = vmatprep.mubr.bf16.mxu1 %v4381_v6 }
 0x183   : > { %v4517_v6 = vrot.slane %v1090_v44, %v1094_v34 }
 0x189   : > { %1638 = vmatmul.mubr.bf16.gmra.mrb[60].mxu1 %v4369_v60  ;;  %v1098_v60 = vsub.s32 1, %v4510_v20 }
 0x18a   : > { %1647 = vmatprep.mubr.bf16.mxu1 %v4402_v33 }
 0x18b   : > { %v4519_v33 = vrot.slane %v1090_v44, %v1098_v60 }
 0x191   : > { %1648 = vmatmul.mubr.bf16.gmra.mrb[64].mxu1 %v4390_v23 }
 0x192   : > { %1657 = vmatprep.mubr.bf16.mxu1 %v4423_v62 }
 0x199   : > { %1658 = vmatmul.mubr.bf16.gmra.mrb[68].mxu1 %v4411_v50 }
 0x19a   : > { %1667 = vmatprep.mubr.bf16.mxu1 %v4444_v27 }
 0x1a1   : > { %1668 = vmatmul.mubr.bf16.gmra.mrb[72].mxu1 %v4432_v15 }
 0x1a2   : > { %1677 = vmatprep.mubr.bf16.mxu1 %v4465_v57 }
 0x1a9   : > { %1678 = vmatmul.mubr.bf16.gmra.mrb[76].mxu1 %v4453_v43 }
 0x1aa   : > { %1687 = vmatprep.mubr.bf16.mxu1 %v1005_v19 }
 0x1b1   : > { %1688 = vmatmul.mubr.bf16.gmra.mrb[80].mxu1 %v4468_v8 }
 0x1b2   : > { %1697 = vmatprep.mubr.bf16.mxu1 %v1009_v42 }
 0x1b9   : > { %1698 = vmatmul.mubr.bf16.gmra.mrb[84].mxu1 %v951_v37 }
 0x1ba   : > { %1707 = vmatprep.mubr.bf16.mxu1 %v1013_v63 }
 0x1c1   : > { %1708 = vmatmul.mubr.bf16.gmra.mrb[88].mxu1 %v953_v55 }
 0x1c2   : > { %1717 = vmatprep.mubr.bf16.mxu1 %v1012_v61 }
 0x1c9   : > { %1718 = vmatmul.mubr.bf16.gmra.mrb[92].mxu1 %v952_v47 }
 0x244   : > { %v1609_v23 = vpop.f32.mrb[48].mxu1 }
 0x245   : > { %v1611_v50 = vpop.f32.mrb[49].mxu1  ;;  %v3561_v15 = vadd.f32 %v1609_v23, %v4517_v6 }
 0x246   : > { %v1613_v62 = vpop.f32.mrb[50].mxu1  ;;  %v3562_v52 = vadd.f32 %v1611_v50, %v4519_v33 }
 0x247   : > { %v3563_v27 = vadd.f32 %v1613_v62, %v4517_v6  ;;  %v1615_v43 = vpop.f32.mrb[51].mxu1 }
 0x248   : > { %v3564_v57 = vadd.f32 %v1615_v43, %v4519_v33 }
 0x249   : > { %v3399_v0 = vpack.c.bf16 %v3563_v27, %v3561_v15 }
 0x24a   : > { %v3397_v1 = vpack.c.bf16 %v3564_v57, %v3562_v52 }
 0x24c   : > { %v1619_v3 = vpop.f32.mrb[52].mxu1  ;;  %3398 = vmatprep.subr.bf16.mxu0 %v3397_v1 }
 0x24d   : > { %v1621_v4 = vpop.f32.mrb[53].mxu1  ;;  %3400 = vmatpush1.bf16.msra.mxu0 %v3399_v0  ;;  %v3565_v2 = vadd.f32 %v1619_v3, %v4517_v6 }
 0x24e   : > { %v1623_v5 = vpop.f32.mrb[54].mxu1  ;;  %v3566_v8 = vadd.f32 %v1621_v4, %v4519_v33 }
 0x24f   : > { %v3567_v56 = vadd.f32 %v1623_v5, %v4517_v6  ;;  %v1625_v7 = vpop.f32.mrb[55].mxu1 }
 0x250   : > { %v3568_v10 = vadd.f32 %v1625_v7, %v4519_v33 }
 0x251   : > { %v3403_v11 = vpack.c.bf16 %v3567_v56, %v3565_v2 }
 0x252   : > { %v3401_v12 = vpack.c.bf16 %v3568_v10, %v3566_v8 }
 0x254   : > { %v1629_v14 = vpop.f32.mrb[56].mxu1  ;;  %3402 = vmatprep.subr.bf16.mxu0 %v3401_v12 }
 0x255   : > { %v1631_v16 = vpop.f32.mrb[57].mxu1  ;;  %3404 = vmatpush1.bf16.msra.mxu0 %v3403_v11  ;;  %v3569_v18 = vadd.f32 %v1629_v14, %v4517_v6 }
 0x256   : > { %v1633_v17 = vpop.f32.mrb[58].mxu1  ;;  %v3570_v24 = vadd.f32 %v1631_v16, %v4519_v33 }
 0x257   : > { %v3571_v19 = vadd.f32 %v1633_v17, %v4517_v6  ;;  %v1635_v21 = vpop.f32.mrb[59].mxu1 }
 0x258   : > { %v3572_v25 = vadd.f32 %v1635_v21, %v4519_v33 }
 0x259   : > { %v3407_v26 = vpack.c.bf16 %v3571_v19, %v3569_v18 }
 0x25a   : > { %v3405_v28 = vpack.c.bf16 %v3572_v25, %v3570_v24 }
 0x25c   : > { %v1639_v30 = vpop.f32.mrb[60].mxu1  ;;  %3406 = vmatprep.subr.bf16.mxu0 %v3405_v28 }
 0x25d   : > { %v1641_v31 = vpop.f32.mrb[61].mxu1  ;;  %3408 = vmatpush1.bf16.msra.mxu0 %v3407_v26  ;;  %v3573_v35 = vadd.f32 %v1639_v30, %v4517_v6 }
 0x25e   : > { %v1643_v32 = vpop.f32.mrb[62].mxu1  ;;  %v3574_v37 = vadd.f32 %v1641_v31, %v4519_v33 }
 0x25f   : > { %v3575_v36 = vadd.f32 %v1643_v32, %v4517_v6  ;;  %v1645_v29 = vpop.f32.mrb[63].mxu1 }
 0x260   : > { %v3576_v38 = vadd.f32 %v1645_v29, %v4519_v33 }
 0x261   : > { %v3411_v22 = vpack.c.bf16 %v3575_v36, %v3573_v35 }
 0x262   : > { %v3409_v39 = vpack.c.bf16 %v3576_v38, %v3574_v37 }
 0x264   : > { %v1649_v41 = vpop.f32.mrb[64].mxu1  ;;  %3410 = vmatprep.subr.bf16.mxu0 %v3409_v39 }
 0x265   : > { %v1651_v40 = vpop.f32.mrb[65].mxu1  ;;  %3412 = vmatpush1.bf16.msra.mxu0 %v3411_v22  ;;  %v3577_v45 = vadd.f32 %v1649_v41, %v4517_v6 }
 0x266   : > { %v1653_v42 = vpop.f32.mrb[66].mxu1  ;;  %v3578_v48 = vadd.f32 %v1651_v40, %v4519_v33 }
 0x267   : > { %v3579_v46 = vadd.f32 %v1653_v42, %v4517_v6  ;;  %v1655_v47 = vpop.f32.mrb[67].mxu1 }
 0x268   : > { %v3580_v51 = vadd.f32 %v1655_v47, %v4519_v33 }
 0x269   : > { %v3415_v53 = vpack.c.bf16 %v3579_v46, %v3577_v45 }
 0x26a   : > { %v3413_v54 = vpack.c.bf16 %v3580_v51, %v3578_v48 }
 0x26c   : > { %v1659_v55 = vpop.f32.mrb[68].mxu1  ;;  %3414 = vmatprep.subr.bf16.mxu0 %v3413_v54 }
 0x26d   : > { %v1661_v58 = vpop.f32.mrb[69].mxu1  ;;  %3416 = vmatpush1.bf16.msra.mxu0 %v3415_v53  ;;  %v3581_v61 = vadd.f32 %v1659_v55, %v4517_v6 }
 0x26e   : > { %v1663_v13 = vpop.f32.mrb[70].mxu1  ;;  %v3582_v34 = vadd.f32 %v1661_v58, %v4519_v33 }
 0x26f   : > { %v3583_v63 = vadd.f32 %v1663_v13, %v4517_v6  ;;  %v1665_v9 = vpop.f32.mrb[71].mxu1 }
 0x270   : > { %v3584_v44 = vadd.f32 %v1665_v9, %v4519_v33 }
 0x271   : > { %v3419_v60 = vpack.c.bf16 %v3583_v63, %v3581_v61 }
 0x272   : > { %v3417_v23 = vpack.c.bf16 %v3584_v44, %v3582_v34 }
 0x274   : > { %v1669_v50 = vpop.f32.mrb[72].mxu1  ;;  %3418 = vmatprep.subr.bf16.mxu0 %v3417_v23 }
 0x275   : > { %v1671_v62 = vpop.f32.mrb[73].mxu1  ;;  %3420 = vmatpush1.bf16.msra.mxu0 %v3419_v60  ;;  %v3585_v27 = vadd.f32 %v1669_v50, %v4517_v6  ;;  %v2693_v50 = vld [vmem:[%s5229_s7] sm:$0xff] }
 0x276   : > { %v1673_v15 = vpop.f32.mrb[74].mxu1  ;;  %v3586_v57 = vadd.f32 %v1671_v62, %v4519_v33 }
 0x277   : > { %v3587_v43 = vadd.f32 %v1673_v15, %v4517_v6  ;;  %v1675_v52 = vpop.f32.mrb[75].mxu1  ;;  %v3914_v15 = vld [vmem:[%s4228_s26 + $0x4] ss:$8 sps:$4 sm:$0xff]  }
 0x278   : > { %v3588_v0 = vadd.f32 %v1675_v52, %v4519_v33  ;;  %v3950_v52 = vld [vmem:[%s5225_s3 + $0x48] sm:$0xff]  }
 0x279   : > { %v3423_v1 = vpack.c.bf16 %v3587_v43, %v3585_v27  ;;  %v3948_v27 = vld [vmem:[%s5225_s3 + $0x40] sm:$0xff]  }
 0x27a   : > { %v3421_v3 = vpack.c.bf16 %v3588_v0, %v3586_v57  ;;  %v3949_v43 = vld [vmem:[%s5225_s3] sm:$0xff]   ;;  %v3951_v57 = vld [vmem:[%s5225_s3 + $0x8] sm:$0xff]   ;;  %v3953_v0 = vld [vmem:[%s5225_s3 + $0x10] sm:$0xff]  }
 0x27c   : > { %v1679_v4 = vpop.f32.mrb[76].mxu1  ;;  %3422 = vmatprep.subr.bf16.mxu0 %v3421_v3  ;;  %v3955_v3 = vld [vmem:[%s5225_s3 + $0x18] sm:$0xff]  }
 0x27d   : > { %v1681_v5 = vpop.f32.mrb[77].mxu1  ;;  %3424 = vmatpush1.bf16.msra.mxu0 %v3423_v1  ;;  %v3589_v56 = vadd.f32 %v1679_v4, %v4517_v6  ;;  %v3954_v1 = vld [vmem:[%s5225_s3 + $0x58] sm:$0xff]   ;;  %v3956_v4 = vld [vmem:[%s5225_s3 + $0x60] sm:$0xff]  }
 0x27e   : > { %v1683_v2 = vpop.f32.mrb[78].mxu1  ;;  %v3590_v10 = vadd.f32 %v1681_v5, %v4519_v33  ;;  %v3957_v5 = vld [vmem:[%s5225_s3 + $0x20] sm:$0xff]  }
 0x27f   : > { %v3591_v7 = vadd.f32 %v1683_v2, %v4517_v6  ;;  %v1685_v8 = vpop.f32.mrb[79].mxu1  ;;  %v3958_v2 = vld [vmem:[%s5225_s3 + $0x68] sm:$0xff]  }
 0x280   : > { %v3592_v11 = vadd.f32 %v1685_v8, %v4519_v33  ;;  %v3961_v8 = vld [vmem:[%s5225_s3 + $0x30] sm:$0xff]  }
 0x281   : > { %v3427_v12 = vpack.c.bf16 %v3591_v7, %v3589_v56  ;;  %v3959_v56 = vld [vmem:[%s5225_s3 + $0x28] sm:$0xff]   ;;  %v3960_v7 = vld [vmem:[%s5225_s3 + $0x70] sm:$0xff]  }
 0x282   : > { %v3425_v14 = vpack.c.bf16 %v3592_v11, %v3590_v10  ;;  %v3962_v10 = vld [vmem:[%s5225_s3 + $0x78] sm:$0xff]   ;;  %v3912_v11 = vld [vmem:[%s4228_s26] ss:$8 sps:$4 sm:$0xff]  }
 0x284   : > { %v1689_v16 = vpop.f32.mrb[80].mxu1  ;;  %3426 = vmatprep.subr.bf16.mxu0 %v3425_v14  ;;  %v3915_v14 = vld [vmem:[%s4228_s26 + $0x14] ss:$8 sps:$4 sm:$0xff]  }
 0x285   : > { %v1691_v17 = vpop.f32.mrb[81].mxu1  ;;  %3428 = vmatpush1.bf16.msra.mxu0 %v3427_v12  ;;  %v3593_v19 = vadd.f32 %v1689_v16, %v4517_v6  ;;  %v3963_v12 = vld [vmem:[%s5225_s3 + $0x38] sm:$0xff]   ;;  %v3964_v16 = vld [vmem:[%s5227_s5 + $0x4] ss:$8 sps:$4 sm:$0xff]  }
 0x286   : > { %v1693_v18 = vpop.f32.mrb[82].mxu1  ;;  %v3594_v25 = vadd.f32 %v1691_v17, %v4519_v33  ;;  %v3965_v17 = vld [vmem:[%s5227_s5] ss:$8 sps:$4 sm:$0xff]  }
 0x287   : > { %v3595_v21 = vadd.f32 %v1693_v18, %v4517_v6  ;;  %v1695_v24 = vpop.f32.mrb[83].mxu1  ;;  %v3966_v18 = vld [vmem:[%s5227_s5 + $0x14] ss:$8 sps:$4 sm:$0xff]  }
 0x288   : > { %v3596_v26 = vadd.f32 %v1695_v24, %v4519_v33  ;;  %v3967_v24 = vld [vmem:[%s5227_s5 + $0x10] ss:$8 sps:$4 sm:$0xff]  }
 0x289   : > { %v3431_v28 = vpack.c.bf16 %v3595_v21, %v3593_v19  ;;  %v3917_v19 = vld [vmem:[%s4228_s26 + $0x10] ss:$8 sps:$4 sm:$0xff]   ;;  %v3918_v21 = vld [vmem:[%s4228_s26 + $0x24] ss:$8 sps:$4 sm:$0xff]  }
 0x28a   : > { %v3429_v30 = vpack.c.bf16 %v3596_v26, %v3594_v25  ;;  %v3968_v25 = vld [vmem:[%s5227_s5 + $0x24] ss:$8 sps:$4 sm:$0xff]   ;;  %v3969_v26 = vld [vmem:[%s5227_s5 + $0x20] ss:$8 sps:$4 sm:$0xff]  }
 0x28c   : > { %v1699_v31 = vpop.f32.mrb[84].mxu1  ;;  %3430 = vmatprep.subr.bf16.mxu0 %v3429_v30  ;;  %v3920_v30 = vld [vmem:[%s4228_s26 + $0x20] ss:$8 sps:$4 sm:$0xff]  }
 0x28d   : > { %v1701_v32 = vpop.f32.mrb[85].mxu1  ;;  %3432 = vmatpush1.bf16.msra.mxu0 %v3431_v28  ;;  %v3597_v36 = vadd.f32 %v1699_v31, %v4517_v6  ;;  %v3970_v28 = vld [vmem:[%s5227_s5 + $0x34] ss:$8 sps:$4 sm:$0xff]  }
 0x28e   : > { %v1703_v35 = vpop.f32.mrb[86].mxu1  ;;  %v3598_v38 = vadd.f32 %v1701_v32, %v4519_v33  ;;  %v3921_v31 = vld [vmem:[%s4228_s26 + $0x34] ss:$8 sps:$4 sm:$0xff]   ;;  %v3971_v32 = vld [vmem:[%s5227_s5 + $0x30] ss:$8 sps:$4 sm:$0xff]  }
 0x28f   : > { %v3599_v29 = vadd.f32 %v1703_v35, %v4517_v6  ;;  %v1705_v37 = vpop.f32.mrb[87].mxu1  ;;  %v3972_v35 = vld [vmem:[%s5227_s5 + $0x44] ss:$8 sps:$4 sm:$0xff]  }
 0x290   : > { %v3600_v22 = vadd.f32 %v1705_v37, %v4519_v33  ;;  %v3923_v37 = vld [vmem:[%s4228_s26 + $0x30] ss:$8 sps:$4 sm:$0xff]  }
 0x291   : > { %v3435_v39 = vpack.c.bf16 %v3599_v29, %v3597_v36  ;;  %v3973_v36 = vld [vmem:[%s5227_s5 + $0x40] ss:$8 sps:$4 sm:$0xff]   ;;  %v3974_v29 = vld [vmem:[%s5227_s5 + $0x54] ss:$8 sps:$4 sm:$0xff]  }
 0x292   : > { %v3433_v41 = vpack.c.bf16 %v3600_v22, %v3598_v38  ;;  %v3924_v38 = vld [vmem:[%s4228_s26 + $0x44] ss:$8 sps:$4 sm:$0xff]   ;;  %v3975_v22 = vld [vmem:[%s5227_s5 + $0x50] ss:$8 sps:$4 sm:$0xff]  }
 0x294   : > { %v1709_v40 = vpop.f32.mrb[88].mxu1  ;;  %3434 = vmatprep.subr.bf16.mxu0 %v3433_v41  ;;  %v3977_v41 = vld [vmem:[%s5227_s5 + $0x60] ss:$8 sps:$4 sm:$0xff]  }
 0x295   : > { %v1711_v42 = vpop.f32.mrb[89].mxu1  ;;  %3436 = vmatpush1.bf16.msra.mxu0 %v3435_v39  ;;  %v3601_v46 = vadd.f32 %v1709_v40, %v4517_v6  ;;  %v3976_v39 = vld [vmem:[%s5227_s5 + $0x64] ss:$8 sps:$4 sm:$0xff]   ;;  %v3978_v40 = vld [vmem:[%s5227_s5 + $0x74] ss:$8 sps:$4 sm:$0xff]  }
 0x296   : > { %v1713_v45 = vpop.f32.mrb[90].mxu1  ;;  %v3602_v51 = vadd.f32 %v1711_v42, %v4519_v33  ;;  %v3926_v42 = vld [vmem:[%s4228_s26 + $0x40] ss:$8 sps:$4 sm:$0xff]  }
 0x297   : > { %v3603_v47 = vadd.f32 %v1713_v45, %v4517_v6  ;;  %v1715_v48 = vpop.f32.mrb[91].mxu1  ;;  %v3927_v45 = vld [vmem:[%s4228_s26 + $0x54] ss:$8 sps:$4 sm:$0xff]  }
 0x298   : > { %v3604_v53 = vadd.f32 %v1715_v48, %v4519_v33  ;;  %v3981_v48 = vld [vmem:[%s5227_s5 + $0x80] ss:$8 sps:$4 sm:$0xff]  }
 0x299   : > { %v3439_v54 = vpack.c.bf16 %v3603_v47, %v3601_v46  ;;  %v3979_v46 = vld [vmem:[%s5227_s5 + $0x70] ss:$8 sps:$4 sm:$0xff]   ;;  %v3980_v47 = vld [vmem:[%s5227_s5 + $0x84] ss:$8 sps:$4 sm:$0xff]  }
 0x29a   : > { %v3437_v55 = vpack.c.bf16 %v3604_v53, %v3602_v51  ;;  %v3982_v51 = vld [vmem:[%s5227_s5 + $0x94] ss:$8 sps:$4 sm:$0xff]   ;;  %v3929_v53 = vld [vmem:[%s4228_s26 + $0x50] ss:$8 sps:$4 sm:$0xff]  }
 0x29c   : > { %v1719_v58 = vpop.f32.mrb[92].mxu1  ;;  %3438 = vmatprep.subr.bf16.mxu0 %v3437_v55  ;;  %v3983_v55 = vld [vmem:[%s5227_s5 + $0x90] ss:$8 sps:$4 sm:$0xff]  }
 0x29d   : > { %v1721_v13 = vpop.f32.mrb[93].mxu1  ;;  %3440 = vmatpush1.bf16.msra.mxu0 %v3439_v54  ;;  %v3605_v63 = vadd.f32 %v1719_v58, %v4517_v6  ;;  %v3930_v54 = vld [vmem:[%s4228_s26 + $0x64] ss:$8 sps:$4 sm:$0xff]  }
 0x29e   : > { %v1723_v61 = vpop.f32.mrb[94].mxu1  ;;  %v3606_v44 = vadd.f32 %v1721_v13, %v4519_v33  ;;  %v3984_v58 = vld [vmem:[%s5227_s5 + $0xa4] ss:$8 sps:$4 sm:$0xff]   ;;  %v3985_v13 = vld [vmem:[%s5227_s5 + $0xa0] ss:$8 sps:$4 sm:$0xff]  }
 0x29f   : > { %v3607_v9 = vadd.f32 %v1723_v61, %v4517_v6  ;;  %v1725_v34 = vpop.f32.mrb[95].mxu1  ;;  %v3986_v61 = vld [vmem:[%s5227_s5 + $0xb4] ss:$8 sps:$4 sm:$0xff]  }
 0x2a0   : > { %v3608_v60 = vadd.f32 %v1725_v34, %v4519_v33  ;;  %v3987_v34 = vld [vmem:[%s5227_s5 + $0xb0] ss:$8 sps:$4 sm:$0xff]  }
 0x2a1   : > { %v3444_v23 = vpack.c.bf16 %v3607_v9, %v3605_v63  ;;  %v3932_v63 = vld [vmem:[%s4228_s26 + $0x60] ss:$8 sps:$4 sm:$0xff]   ;;  %v3933_v9 = vld [vmem:[%s4228_s26 + $0x74] ss:$8 sps:$4 sm:$0xff]  }
 0x2a2   : > { %v3441_v62 = vpack.c.bf16 %v3608_v60, %v3606_v44  ;;  %v3988_v44 = vld [vmem:[%s5227_s5 + $0xc4] ss:$8 sps:$4 sm:$0xff]   ;;  %v3989_v60 = vld [vmem:[%s5227_s5 + $0xc0] ss:$8 sps:$4 sm:$0xff]  }
 0x2a4   : > { %3443 = vmatprep.subr.msk.bf16.mxu0 %vm4569_vm6, %v3441_v62  ;;  %v3935_v62 = vld [vmem:[%s4228_s26 + $0x70] ss:$8 sps:$4 sm:$0xff]  }
 0x2a5   : > { %3446 = vmatpush1.bf16.msk.msra.mxu0 %vm4569_vm6, %v3444_v23  ;;  %v3990_v23 = vld [vmem:[%s5227_s5 + $0xd4] ss:$8 sps:$4 sm:$0xff]  }
 0x2a6   : > { %3239 = vmatprep.subr.bf16.mxu0 %v3948_v27  ;;  %v3991_v27 = vld [vmem:[%s5227_s5 + $0xd0] ss:$8 sps:$4 sm:$0xff]  }
 0x2a8   : > { %1806 = vmatmul.mubr.f32.vlgmr.msra.gmra.mrb[0].mxu0 %v4502_v49  ;;  %v3952_v49 = vld [vmem:[%s5225_s3 + $0x50] sm:$0xff]  }
 0x2a9   : > { %3240 = vmatpush3.bf16.msra.mxu0 %v3949_v43  ;;  %1988 = vmatprep.mubr.bf16.mxu0 %v3914_v15  ;;  %v3936_v15 = vld [vmem:[%s4228_s26 + $0x84] ss:$8 sps:$4 sm:$0xff]  }
 0x2aa   : > { %3241 = vmatprep.subr.bf16.mxu0 %v3950_v52  ;;  %v3992_v43 = vld [vmem:[%s5227_s5 + $0xe4] ss:$8 sps:$4 sm:$0xff]   ;;  %v3993_v52 = vld [vmem:[%s5227_s5 + $0xe0] ss:$8 sps:$4 sm:$0xff]  }
 0x2ad   : > { %3242 = vmatpush3.bf16.msra.mxu0 %v3951_v57  ;;  %v3994_v57 = vld [vmem:[%s5227_s5 + $0xf4] ss:$8 sps:$4 sm:$0xff]  }
 0x2ae   : > { %3243 = vmatprep.subr.bf16.mxu0 %v3952_v49  ;;  %v3938_v49 = vld [vmem:[%s4228_s26 + $0x80] ss:$8 sps:$4 sm:$0xff]  }
 0x2b1   : > { %3244 = vmatpush3.bf16.msra.mxu0 %v3953_v0  ;;  %v3939_v0 = vld [vmem:[%s4228_s26 + $0x94] ss:$8 sps:$4 sm:$0xff]  }
 0x2b2   : > { %3245 = vmatprep.subr.bf16.mxu0 %v3954_v1  ;;  %v3995_v1 = vld [vmem:[%s5227_s5 + $0xf0] ss:$8 sps:$4 sm:$0xff]  }
 0x2b5   : > { %3246 = vmatpush3.bf16.msra.mxu0 %v3955_v3  ;;  %v3996_v3 = vld [vmem:[%s5227_s5 + $0x104] ss:$8 sps:$4 sm:$0xff]  }
 0x2b6   : > { %3247 = vmatprep.subr.bf16.mxu0 %v3956_v4  ;;  %v3941_v4 = vld [vmem:[%s4228_s26 + $0x90] ss:$8 sps:$4 sm:$0xff]  }
 0x2b9   : > { %3248 = vmatpush3.bf16.msra.mxu0 %v3957_v5  ;;  %v3942_v5 = vld [vmem:[%s4228_s26 + $0xa4] ss:$8 sps:$4 sm:$0xff]  }
 0x2ba   : > { %3249 = vmatprep.subr.bf16.mxu0 %v3958_v2  ;;  %v3944_v2 = vld [vmem:[%s4228_s26 + $0xa0] ss:$8 sps:$4 sm:$0xff]  }
 0x2bd   : > { %3250 = vmatpush3.bf16.msra.mxu0 %v3959_v56  ;;  %v3945_v56 = vld [vmem:[%s4228_s26 + $0xb4] ss:$8 sps:$4 sm:$0xff]  }
 0x2be   : > { %3251 = vmatprep.subr.bf16.mxu0 %v3960_v7  ;;  %v3947_v7 = vld [vmem:[%s4228_s26 + $0xb0] ss:$8 sps:$4 sm:$0xff]  }
 0x2c1   : > { %3252 = vmatpush3.bf16.msra.mxu0 %v3961_v8 }
 0x2c2   : > { %3253 = vmatprep.subr.bf16.mxu0 %v3962_v10 }
 0x2c5   : > { %3254 = vmatpush3.bf16.msra.mxu0 %v3963_v12 }
 0x2c6   : > { %2310 = vmatprep.subr.bf16.mxu0 %v3964_v16 }
 0x2c8   : > { %1989 = vmatmul.mubr.bf16.vlgmr.msra.gmra.mrb[4].mxu0 %v3912_v11 }
 0x2c9   : > { %1996 = vmatprep.mubr.bf16.mxu0 %v3915_v14  ;;  %2311 = vmatpush1.bf16.msra.mxu0 %v3965_v17 }
 0x2ca   : > { %2312 = vmatprep.subr.bf16.mxu0 %v3966_v18 }
 0x2cd   : > { %2313 = vmatpush1.bf16.msra.mxu0 %v3967_v24 }
 0x2ce   : > { %2314 = vmatprep.subr.bf16.mxu0 %v3968_v25 }
 0x2d0   : > { %1997 = vmatmul.mubr.bf16.gmra.mrb[8].mxu0 %v3917_v19  ;;  %v4756_v19 = vld [vmem:[%s5226_s4] ss:$0 sm:$0xff] }
 0x2d1   : > { %2004 = vmatprep.mubr.bf16.mxu0 %v3918_v21  ;;  %2315 = vmatpush1.bf16.msra.mxu0 %v3969_v26 }
 0x2d2   : > { %2316 = vmatprep.subr.bf16.mxu0 %v3970_v28 }
 0x2d5   : > { %2317 = vmatpush1.bf16.msra.mxu0 %v3971_v32 }
 0x2d6   : > { %2318 = vmatprep.subr.bf16.mxu0 %v3972_v35 }
 0x2d8   : > { %2005 = vmatmul.mubr.bf16.gmra.mrb[12].mxu0 %v3920_v30 }
 0x2d9   : > { %2012 = vmatprep.mubr.bf16.mxu0 %v3921_v31  ;;  %2319 = vmatpush1.bf16.msra.mxu0 %v3973_v36 }
 0x2da   : > { %2320 = vmatprep.subr.bf16.mxu0 %v3974_v29 }
 0x2dd   : > { %2321 = vmatpush1.bf16.msra.mxu0 %v3975_v22 }
 0x2de   : > { %2322 = vmatprep.subr.bf16.mxu0 %v3976_v39 }
 0x2e0   : > { %2013 = vmatmul.mubr.bf16.gmra.mrb[16].mxu0 %v3923_v37 }
 0x2e1   : > { %2020 = vmatprep.mubr.bf16.mxu0 %v3924_v38  ;;  %2323 = vmatpush1.bf16.msra.mxu0 %v3977_v41 }
 0x2e2   : > { %2324 = vmatprep.subr.bf16.mxu0 %v3978_v40 }
 0x2e5   : > { %2325 = vmatpush1.bf16.msra.mxu0 %v3979_v46 }
 0x2e6   : > { %2326 = vmatprep.subr.bf16.mxu0 %v3980_v47 }
 0x2e8   : > { %2021 = vmatmul.mubr.bf16.gmra.mrb[20].mxu0 %v3926_v42 }
 0x2e9   : > { %2028 = vmatprep.mubr.bf16.mxu0 %v3927_v45  ;;  %2327 = vmatpush1.bf16.msra.mxu0 %v3981_v48 }
 0x2ea   : > { %2328 = vmatprep.subr.bf16.mxu0 %v3982_v51 }
 0x2ed   : > { %2329 = vmatpush1.bf16.msra.mxu0 %v3983_v55 }
 0x2ee   : > { %2330 = vmatprep.subr.bf16.mxu0 %v3984_v58 }
 0x2f0   : > { %2029 = vmatmul.mubr.bf16.gmra.mrb[24].mxu0 %v3929_v53 }
 0x2f1   : > { %2036 = vmatprep.mubr.bf16.mxu0 %v3930_v54  ;;  %2331 = vmatpush1.bf16.msra.mxu0 %v3985_v13 }
 0x2f2   : > { %2332 = vmatprep.subr.bf16.mxu0 %v3986_v61 }
 0x2f5   : > { %2333 = vmatpush1.bf16.msra.mxu0 %v3987_v34 }
 0x2f6   : > { %2334 = vmatprep.subr.bf16.mxu0 %v3988_v44 }
 0x2f8   : > { %2037 = vmatmul.mubr.bf16.gmra.mrb[28].mxu0 %v3932_v63 }
 0x2f9   : > { %2044 = vmatprep.mubr.bf16.mxu0 %v3933_v9  ;;  %2335 = vmatpush1.bf16.msra.mxu0 %v3989_v60 }
 0x2fa   : > { %2336 = vmatprep.subr.bf16.mxu0 %v3990_v23 }
 0x2fd   : > { %2337 = vmatpush1.bf16.msra.mxu0 %v3991_v27 }
 0x2fe   : > { %2338 = vmatprep.subr.bf16.mxu0 %v3992_v43 }
 0x300   : > { %2045 = vmatmul.mubr.bf16.gmra.mrb[32].mxu0 %v3935_v62 }
 0x301   : > { %2052 = vmatprep.mubr.bf16.mxu0 %v3936_v15  ;;  %2339 = vmatpush1.bf16.msra.mxu0 %v3993_v52 }
 0x302   : > { %2340 = vmatprep.subr.bf16.mxu0 %v3994_v57  ;;  %v3998_v57 = vld [vmem:[%s5227_s5 + $0x100] ss:$8 sps:$4 sm:$0xff]  }
 0x305   : > { %2341 = vmatpush1.bf16.msra.mxu0 %v3995_v1 }
 0x306   : > { %2463 = vmatprep.subr.bf16.mxu0 %v3996_v3 }
 0x308   : > { %2053 = vmatmul.mubr.bf16.gmra.mrb[36].mxu0 %v3938_v49 }
 0x309   : > { %2060 = vmatprep.mubr.bf16.mxu0 %v3939_v0 }
 0x310   : > { %2061 = vmatmul.mubr.bf16.gmra.mrb[40].mxu0 %v3941_v4  ;;  %v3999_v4 = vld [vmem:[%s5227_s5 + $0x114] ss:$8 sps:$4 sm:$0xff]  }
 0x311   : > { %2068 = vmatprep.mubr.bf16.mxu0 %v3942_v5 }
 0x318   : > { %2069 = vmatmul.mubr.bf16.gmra.mrb[44].mxu0 %v3944_v2 }
 0x319   : > { %2076 = vmatprep.mubr.bf16.mxu0 %v3945_v56 }
 0x320   : > { %2077 = vmatmul.mubr.bf16.gmra.mrb[48].mxu0 %v3947_v7 }
 0x37b   : > { %v4749_v8 = vpop.f32.mrb[0].mxu0 }
 0x37c   : > { %v4751_v10 = vpop.f32.mrb[1].mxu0 }
 0x39b   : > { %v3255_v11 = vpop.f32.mrb[4].mxu0 }
 0x39c   : > { %v3256_v12 = vpop.f32.mrb[5].mxu0 }
 0x39d   : > { %v3257_v14 = vadd.f32 %v3256_v12, %v3255_v11  ;;  %v3258_v16 = vpop.f32.mrb[6].mxu0 }
 0x39e   : > { %v3259_v17 = vpop.f32.mrb[7].mxu0 }
 0x39f   : > { %v3260_v18 = vadd.f32 %v3259_v17, %v3258_v16  ;;  %v1991_v21 = vadd.f32 %v4756_v19, %v3257_v14  ;;  %v4000_v16 = vld [vmem:[%s5227_s5 + $0x110] ss:$8 sps:$4 sm:$0xff]  }
 0x3a1   : > { %v1994_v24 = vadd.f32 %v4756_v19, %v3260_v18 }
 0x3a3   : > { %v2085_v25 = vpack.c.bf16 %v1994_v24, %v1991_v21  ;;  %v3261_v26 = vpop.f32.mrb[8].mxu0 }
 0x3a4   : > { %v3262_v28 = vpop.f32.mrb[9].mxu0 }
 0x3a5   : > { %v3263_v30 = vadd.f32 %v3262_v28, %v3261_v26  ;;  %v3264_v31 = vpop.f32.mrb[10].mxu0  ;;  %v2098_v32 = vshrl.u32 %v2085_v25, 16  ;;  %v2100_v35 = vshll.u32 %v2085_v25, 16  ;;  %v2216_v58 = vrot.slane %v2085_v25, 1  ;;  %v4001_v26 = vld [vmem:[%s5227_s5 + $0x124] ss:$8 sps:$4 sm:$0xff]  }
 0x3a6   : > { %v3265_v36 = vpop.f32.mrb[11].mxu0 }
 0x3a7   : > { %v3266_v29 = vadd.f32 %v3265_v36, %v3264_v31  ;;  %v2251_v37 = vrot.slane %v2098_v32, 1  ;;  %v2252_v38 = vrot.slane %v2100_v35, 2  ;;  %v1999_v22 = vadd.f32 %v4756_v19, %v3263_v30 }
 0x3a8   : > { %v2102_v45 = vrot.slane %v2100_v35, 1  ;;  %v4002_v35 = vld [vmem:[%s5227_s5 + $0x120] ss:$8 sps:$4 sm:$0xff]  }
 0x3a9   : > { %v2002_v39 = vadd.f32 %v4756_v19, %v3266_v29  ;;  %v2253_v41 = vor.u32 %v2252_v38, %v2251_v37 }
 0x3aa   : > { %v2103_v61 = vor.u32 %v2102_v45, %v2098_v32 }
 0x3ab   : > { %v2086_v40 = vpack.c.bf16 %v2002_v39, %v1999_v22  ;;  %v3267_v42 = vpop.f32.mrb[12].mxu0  ;;  %v4003_v22 = vld [vmem:[%s5227_s5 + $0x134] ss:$8 sps:$4 sm:$0xff]  }
 0x3ac   : > { %v3268_v46 = vpop.f32.mrb[13].mxu0 }
 0x3ad   : > { %v3269_v47 = vadd.f32 %v3268_v46, %v3267_v42  ;;  %v3270_v48 = vpop.f32.mrb[14].mxu0  ;;  %v2105_v51 = vshll.u32 %v2086_v40, 16  ;;  %v2109_v53 = vshrl.u32 %v2086_v40, 16  ;;  %v2217_v54 = vrot.slane %v2086_v40, 1 }
 0x3ae   : > { %v3271_v55 = vpop.f32.mrb[15].mxu0 }
 0x3af   : > { %v3272_v13 = vadd.f32 %v3271_v55, %v3270_v48  ;;  %v2107_v63 = vrot.slane %v2105_v51, 1  ;;  %v2254_v9 = vrot.slane %v2109_v53, 1  ;;  %v2255_v34 = vrot.slane %v2105_v51, 2  ;;  %v4004_v48 = vld [vmem:[%s5227_s5 + $0x130] ss:$8 sps:$4 sm:$0xff]  }
 0x3b0   : > { %v4763_v44 = vsel %vm930_vm0, %v2216_v58, %v2217_v54  ;;  %v2007_v60 = vadd.f32 %v4756_v19, %v3269_v47 }
 0x3b1   : > { %v2010_v23 = vadd.f32 %v4756_v19, %v3272_v13  ;;  %v2108_v62 = vsel %vm810_vm1, %v2103_v61, %v2107_v63  ;;  %v2256_v15 = vor.u32 %v2255_v34, %v2254_v9  ;;  %v2111_v11 = vor.u32 %v2109_v53, %v2107_v63  ;;  %v4005_v13 = vld [vmem:[%s5227_s5 + $0x144] ss:$8 sps:$4 sm:$0xff]  }
 0x3b2   : > { %2342 = vmatprep.mubr.bf16.mxu0 %v2108_v62 }
 0x3b3   : > { %v2087_v27 = vpack.c.bf16 %v2010_v23, %v2007_v60  ;;  %v3273_v43 = vpop.f32.mrb[16].mxu0  ;;  %2343 = vmatmul.mubr.bf16.vlgmr.msra.gmra.mrb[52].mxu0 %v2085_v25  ;;  %v4772_v49 = vsel %vm966_vm2, %v2253_v41, %v2256_v15  ;;  %v4006_v60 = vld [vmem:[%s5227_s5 + $0x140] ss:$8 sps:$4 sm:$0xff]  }
 0x3b4   : > { %v3274_v52 = vpop.f32.mrb[17].mxu0  ;;  %2464 = vmatpush1.bf16.msra.mxu0 %v3998_v57  ;;  %v4007_v57 = vld [vmem:[%s5227_s5 + $0x154] ss:$8 sps:$4 sm:$0xff]  }
 0x3b5   : > { %v3275_v0 = vadd.f32 %v3274_v52, %v3273_v43  ;;  %v3276_v1 = vpop.f32.mrb[18].mxu0  ;;  %v2113_v3 = vshll.u32 %v2087_v27, 16  ;;  %2465 = vmatprep.subr.bf16.mxu0 %v3999_v4  ;;  %v2117_v5 = vshrl.u32 %v2087_v27, 16  ;;  %v2219_v2 = vrot.slane %v2087_v27, 1 }
 0x3b6   : > { %v3277_v56 = vpop.f32.mrb[19].mxu0 }
 0x3b7   : > { %v3278_v7 = vadd.f32 %v3277_v56, %v3276_v1  ;;  %v2115_v12 = vrot.slane %v2113_v3, 1  ;;  %v2258_v14 = vrot.slane %v2117_v5, 1  ;;  %v2259_v17 = vrot.slane %v2113_v3, 2 }
 0x3b8   : > { %2466 = vmatpush1.bf16.msra.mxu0 %v4000_v16  ;;  %v4781_v18 = vsel %vm930_vm0, %v2217_v54, %v2219_v2  ;;  %v2015_v21 = vadd.f32 %v4756_v19, %v3275_v0  ;;  %v4009_v16 = vld [vmem:[%s5227_s5 + $0x164] ss:$8 sps:$4 sm:$0xff]  }
 0x3b9   : > { %v2018_v24 = vadd.f32 %v4756_v19, %v3278_v7  ;;  %v2116_v25 = vsel %vm810_vm1, %v2111_v11, %v2115_v12  ;;  %2467 = vmatprep.subr.bf16.mxu0 %v4001_v26  ;;  %v2260_v28 = vor.u32 %v2259_v17, %v2258_v14  ;;  %v2119_v45 = vor.u32 %v2117_v5, %v2115_v12  ;;  %v4010_v26 = vld [vmem:[%s5227_s5 + $0x160] ss:$8 sps:$4 sm:$0xff]  }
 0x3ba   : > { %2352 = vmatprep.mubr.bf16.mxu0 %v2116_v25 }
 0x3bb   : > { %v2088_v30 = vpack.c.bf16 %v2018_v24, %v2015_v21  ;;  %v3279_v31 = vpop.f32.mrb[20].mxu0  ;;  %2353 = vmatmul.mubr.bf16.gmra.mrb[56].mxu0 %v2086_v40  ;;  %v4793_v36 = vsel %vm966_vm2, %v2256_v15, %v2260_v28 }
 0x3bc   : > { %v3280_v32 = vpop.f32.mrb[21].mxu0  ;;  %2468 = vmatpush1.bf16.msra.mxu0 %v4002_v35 }
 0x3bd   : > { %v3281_v29 = vadd.f32 %v3280_v32, %v3279_v31  ;;  %v3282_v37 = vpop.f32.mrb[22].mxu0  ;;  %v2121_v38 = vshll.u32 %v2088_v30, 16  ;;  %2469 = vmatprep.subr.bf16.mxu0 %v4003_v22  ;;  %v2125_v39 = vshrl.u32 %v2088_v30, 16  ;;  %v2221_v41 = vrot.slane %v2088_v30, 1 }
 0x3be   : > { %v3283_v40 = vpop.f32.mrb[23].mxu0 }
 0x3bf   : > { %v3284_v42 = vadd.f32 %v3283_v40, %v3282_v37  ;;  %v2123_v46 = vrot.slane %v2121_v38, 1  ;;  %v2262_v47 = vrot.slane %v2125_v39, 1  ;;  %v2263_v51 = vrot.slane %v2121_v38, 2  ;;  %v4011_v37 = vld [vmem:[%s5227_s5 + $0x174] ss:$8 sps:$4 sm:$0xff]  }
 0x3c0   : > { %2470 = vmatpush1.bf16.msra.mxu0 %v4004_v48  ;;  %v4802_v53 = vsel %vm930_vm0, %v2219_v2, %v2221_v41  ;;  %v2023_v54 = vadd.f32 %v4756_v19, %v3281_v29  ;;  %v4008_v2 = vld [vmem:[%s5227_s5 + $0x150] ss:$8 sps:$4 sm:$0xff]  }
 0x3c1   : > { %v2026_v55 = vadd.f32 %v4756_v19, %v3284_v42  ;;  %v2124_v58 = vsel %vm810_vm1, %v2119_v45, %v2123_v46  ;;  %2471 = vmatprep.subr.bf16.mxu0 %v4005_v13  ;;  %v2264_v61 = vor.u32 %v2263_v51, %v2262_v47  ;;  %v2127_v3 = vor.u32 %v2125_v39, %v2123_v46  ;;  %v4012_v42 = vld [vmem:[%s5227_s5 + $0x170] ss:$8 sps:$4 sm:$0xff]  }
 0x3c2   : > { %2362 = vmatprep.mubr.bf16.mxu0 %v2124_v58 }
 0x3c3   : > { %v2089_v63 = vpack.c.bf16 %v2026_v55, %v2023_v54  ;;  %v3285_v9 = vpop.f32.mrb[24].mxu0  ;;  %2363 = vmatmul.mubr.bf16.gmra.mrb[60].mxu0 %v2087_v27  ;;  %v4814_v23 = vsel %vm966_vm2, %v2260_v28, %v2264_v61  ;;  %v4013_v54 = vld [vmem:[%s5227_s5 + $0x184] ss:$8 sps:$4 sm:$0xff]  }
 0x3c4   : > { %v3286_v34 = vpop.f32.mrb[25].mxu0  ;;  %2472 = vmatpush1.bf16.msra.mxu0 %v4006_v60 }
 0x3c5   : > { %v3287_v62 = vadd.f32 %v3286_v34, %v3285_v9  ;;  %v3288_v15 = vpop.f32.mrb[26].mxu0  ;;  %v2129_v43 = vshll.u32 %v2089_v63, 16  ;;  %v2133_v52 = vshrl.u32 %v2089_v63, 16  ;;  %2473 = vmatprep.subr.bf16.mxu0 %v4007_v57  ;;  %v2223_v0 = vrot.slane %v2089_v63, 1  ;;  %v4014_v9 = vld [vmem:[%s5227_s5 + $0x180] ss:$8 sps:$4 sm:$0xff]  }
 0x3c6   : > { %v3289_v27 = vpop.f32.mrb[27].mxu0 }
 0x3c7   : > { %v3290_v1 = vadd.f32 %v3289_v27, %v3288_v15  ;;  %v2131_v4 = vrot.slane %v2129_v43, 1  ;;  %v2266_v5 = vrot.slane %v2133_v52, 1  ;;  %v2267_v56 = vrot.slane %v2129_v43, 2 }
 0x3c8   : > { %2474 = vmatpush1.bf16.msra.mxu0 %v4008_v2  ;;  %v4823_v7 = vsel %vm930_vm0, %v2221_v41, %v2223_v0  ;;  %v2031_v11 = vadd.f32 %v4756_v19, %v3287_v62 }
 0x3c9   : > { %v2034_v12 = vadd.f32 %v4756_v19, %v3290_v1  ;;  %v2132_v14 = vsel %vm810_vm1, %v2127_v3, %v2131_v4  ;;  %2475 = vmatprep.subr.bf16.mxu0 %v4009_v16  ;;  %v2268_v17 = vor.u32 %v2267_v56, %v2266_v5  ;;  %v2135_v39 = vor.u32 %v2133_v52, %v2131_v4  ;;  %v4015_v52 = vld [vmem:[%s5227_s5 + $0x194] ss:$8 sps:$4 sm:$0xff]   ;;  %v4016_v4 = vld [vmem:[%s5227_s5 + $0x190] ss:$8 sps:$4 sm:$0xff]  }
 0x3ca   : > { %2372 = vmatprep.mubr.bf16.mxu0 %v2132_v14  ;;  %v4017_v14 = vld [vmem:[%s5227_s5 + $0x1a4] ss:$8 sps:$4 sm:$0xff]  }
 0x3cb   : > { %v2090_v21 = vpack.c.bf16 %v2034_v12, %v2031_v11  ;;  %v3291_v24 = vpop.f32.mrb[28].mxu0  ;;  %2373 = vmatmul.mubr.bf16.gmra.mrb[64].mxu0 %v2088_v30  ;;  %v4835_v28 = vsel %vm966_vm2, %v2264_v61, %v2268_v17 }
 0x3cc   : > { %v3292_v25 = vpop.f32.mrb[29].mxu0  ;;  %2476 = vmatpush1.bf16.msra.mxu0 %v4010_v26  ;;  %v4018_v26 = vld [vmem:[%s5227_s5 + $0x1a0] ss:$8 sps:$4 sm:$0xff]  }
 0x3cd   : > { %v3293_v31 = vadd.f32 %v3292_v25, %v3291_v24  ;;  %v3294_v32 = vpop.f32.mrb[30].mxu0  ;;  %v2137_v35 = vshll.u32 %v2090_v21, 16  ;;  %v2141_v29 = vshrl.u32 %v2090_v21, 16  ;;  %2477 = vmatprep.subr.bf16.mxu0 %v4011_v37  ;;  %v2225_v38 = vrot.slane %v2090_v21, 1 }
 0x3ce   : > { %v3295_v30 = vpop.f32.mrb[31].mxu0 }
 0x3cf   : > { %v3296_v22 = vadd.f32 %v3295_v30, %v3294_v32  ;;  %v2139_v41 = vrot.slane %v2137_v35, 1  ;;  %v2270_v40 = vrot.slane %v2141_v29, 1  ;;  %v2271_v45 = vrot.slane %v2137_v35, 2 }
 0x3d0   : > { %2478 = vmatpush1.bf16.msra.mxu0 %v4012_v42  ;;  %v4844_v46 = vsel %vm930_vm0, %v2223_v0, %v2225_v38  ;;  %v2039_v47 = vadd.f32 %v4756_v19, %v3293_v31  ;;  %v4020_v42 = vld [vmem:[%s5227_s5 + $0x1b0] ss:$8 sps:$4 sm:$0xff]  }
 0x3d1   : > { %v2042_v48 = vadd.f32 %v4756_v19, %v3296_v22  ;;  %v2140_v51 = vsel %vm810_vm1, %v2135_v39, %v2139_v41  ;;  %2479 = vmatprep.subr.bf16.mxu0 %v4013_v54  ;;  %v2272_v55 = vor.u32 %v2271_v45, %v2270_v40  ;;  %v2143_v27 = vor.u32 %v2141_v29, %v2139_v41 }
 0x3d2   : > { %2382 = vmatprep.mubr.bf16.mxu0 %v2140_v51 }
 0x3d3   : > { %v2091_v58 = vpack.c.bf16 %v2042_v48, %v2039_v47  ;;  %v3297_v13 = vpop.f32.mrb[32].mxu0  ;;  %2383 = vmatmul.mubr.bf16.gmra.mrb[68].mxu0 %v2089_v63  ;;  %v4856_v34 = vsel %vm966_vm2, %v2268_v17, %v2272_v55 }
 0x3d4   : > { %v3298_v61 = vpop.f32.mrb[33].mxu0  ;;  %2480 = vmatpush1.bf16.msra.mxu0 %v4014_v9 }
 0x3d5   : > { %v3299_v60 = vadd.f32 %v3298_v61, %v3297_v13  ;;  %v3300_v62 = vpop.f32.mrb[34].mxu0  ;;  %v2145_v15 = vshll.u32 %v2091_v58, 16  ;;  %v2149_v43 = vshrl.u32 %v2091_v58, 16  ;;  %2481 = vmatprep.subr.bf16.mxu0 %v4015_v52  ;;  %v2227_v57 = vrot.slane %v2091_v58, 1 }
 0x3d6   : > { %v3301_v63 = vpop.f32.mrb[35].mxu0 }
 0x3d7   : > { %v3302_v0 = vadd.f32 %v3301_v63, %v3300_v62  ;;  %v2147_v1 = vrot.slane %v2145_v15, 1  ;;  %v2274_v3 = vrot.slane %v2149_v43, 1  ;;  %v2275_v5 = vrot.slane %v2145_v15, 2  ;;  %v4022_v62 = vld [vmem:[%s5227_s5 + $0x1c0] ss:$8 sps:$4 sm:$0xff]  }
 0x3d8   : > { %2482 = vmatpush1.bf16.msra.mxu0 %v4016_v4  ;;  %v4865_v2 = vsel %vm930_vm0, %v2225_v38, %v2227_v57  ;;  %v2047_v56 = vadd.f32 %v4756_v19, %v3299_v60  ;;  %v4019_v38 = vld [vmem:[%s5227_s5 + $0x1b4] ss:$8 sps:$4 sm:$0xff]  }
 0x3d9   : > { %v2050_v11 = vadd.f32 %v4756_v19, %v3302_v0  ;;  %v2148_v12 = vsel %vm810_vm1, %v2143_v27, %v2147_v1  ;;  %2483 = vmatprep.subr.bf16.mxu0 %v4017_v14  ;;  %v2276_v16 = vor.u32 %v2275_v5, %v2274_v3  ;;  %v2151_v39 = vor.u32 %v2149_v43, %v2147_v1  ;;  %v4023_v0 = vld [vmem:[%s5227_s5 + $0x1d4] ss:$8 sps:$4 sm:$0xff]  }
 0x3da   : > { %2392 = vmatprep.mubr.bf16.mxu0 %v2148_v12 }
 0x3db   : > { %v2092_v17 = vpack.c.bf16 %v2050_v11, %v2047_v56  ;;  %v3303_v24 = vpop.f32.mrb[36].mxu0  ;;  %2393 = vmatmul.mubr.bf16.gmra.mrb[72].mxu0 %v2090_v21  ;;  %v4877_v31 = vsel %vm966_vm2, %v2272_v55, %v2276_v16  ;;  %v4021_v55 = vld [vmem:[%s5227_s5 + $0x1c4] ss:$8 sps:$4 sm:$0xff]   ;;  %v4024_v56 = vld [vmem:[%s5227_s5 + $0x1d0] ss:$8 sps:$4 sm:$0xff]  }
 0x3dc   : > { %v3304_v25 = vpop.f32.mrb[37].mxu0  ;;  %2484 = vmatpush1.bf16.msra.mxu0 %v4018_v26 }
 0x3dd   : > { %v3305_v32 = vadd.f32 %v3304_v25, %v3303_v24  ;;  %v3306_v35 = vpop.f32.mrb[38].mxu0  ;;  %v2153_v29 = vshll.u32 %v2092_v17, 16  ;;  %v2157_v37 = vshrl.u32 %v2092_v17, 16  ;;  %2485 = vmatprep.subr.bf16.mxu0 %v4019_v38  ;;  %v2229_v30 = vrot.slane %v2092_v17, 1  ;;  %v4025_v25 = vld [vmem:[%s5227_s5 + $0x1e4] ss:$8 sps:$4 sm:$0xff]  }
 0x3de   : > { %v3307_v21 = vpop.f32.mrb[39].mxu0 }
 0x3df   : > { %v3308_v22 = vadd.f32 %v3307_v21, %v3306_v35  ;;  %v2155_v41 = vrot.slane %v2153_v29, 1  ;;  %v2278_v40 = vrot.slane %v2157_v37, 1  ;;  %v2279_v45 = vrot.slane %v2153_v29, 2 }
 0x3e0   : > { %2486 = vmatpush1.bf16.msra.mxu0 %v4020_v42  ;;  %v4886_v47 = vsel %vm930_vm0, %v2227_v57, %v2229_v30  ;;  %v2055_v48 = vadd.f32 %v4756_v19, %v3305_v32 }
 0x3e1   : > { %v2058_v51 = vadd.f32 %v4756_v19, %v3308_v22  ;;  %v2156_v54 = vsel %vm810_vm1, %v2151_v39, %v2155_v41  ;;  %2487 = vmatprep.subr.bf16.mxu0 %v4021_v55  ;;  %v2280_v13 = vor.u32 %v2279_v45, %v2278_v40  ;;  %v2159_v3 = vor.u32 %v2157_v37, %v2155_v41  ;;  %v4026_v37 = vld [vmem:[%s5227_s5 + $0x1e0] ss:$8 sps:$4 sm:$0xff]   ;;  %v4027_v41 = vld [vmem:[%s5227_s5 + $0x1f4] ss:$8 sps:$4 sm:$0xff]  }
 0x3e2   : > { %2402 = vmatprep.mubr.bf16.mxu0 %v2156_v54  ;;  %v4028_v54 = vld [vmem:[%s5227_s5 + $0x1f0] ss:$8 sps:$4 sm:$0xff]  }
 0x3e3   : > { %v2093_v61 = vpack.c.bf16 %v2058_v51, %v2055_v48  ;;  %v3309_v9 = vpop.f32.mrb[40].mxu0  ;;  %2403 = vmatmul.mubr.bf16.gmra.mrb[76].mxu0 %v2091_v58  ;;  %v4898_v15 = vsel %vm966_vm2, %v2276_v16, %v2280_v13 }
 0x3e4   : > { %v3310_v60 = vpop.f32.mrb[41].mxu0  ;;  %2488 = vmatpush1.bf16.msra.mxu0 %v4022_v62 }
 0x3e5   : > { %v3311_v43 = vadd.f32 %v3310_v60, %v3309_v9  ;;  %v3312_v52 = vpop.f32.mrb[42].mxu0  ;;  %v2161_v57 = vshll.u32 %v2093_v61, 16  ;;  %v2165_v63 = vshrl.u32 %v2093_v61, 16  ;;  %2489 = vmatprep.subr.bf16.mxu0 %v4023_v0  ;;  %v2231_v27 = vrot.slane %v2093_v61, 1 }
 0x3e6   : > { %v3313_v58 = vpop.f32.mrb[43].mxu0 }
 0x3e7   : > { %v3314_v1 = vadd.f32 %v3313_v58, %v3312_v52  ;;  %v2163_v4 = vrot.slane %v2161_v57, 1  ;;  %v2282_v5 = vrot.slane %v2165_v63, 1  ;;  %v2283_v11 = vrot.slane %v2161_v57, 2 }
 0x3e8   : > { %2490 = vmatpush1.bf16.msra.mxu0 %v4024_v56  ;;  %v4907_v12 = vsel %vm930_vm0, %v2229_v30, %v2231_v27  ;;  %v2063_v14 = vadd.f32 %v4756_v19, %v3311_v43 }
 0x3e9   : > { %v2066_v16 = vadd.f32 %v4756_v19, %v3314_v1  ;;  %v2164_v24 = vsel %vm810_vm1, %v2159_v3, %v2163_v4  ;;  %2491 = vmatprep.subr.bf16.mxu0 %v4025_v25  ;;  %v2284_v26 = vor.u32 %v2283_v11, %v2282_v5  ;;  %v2167_v45 = vor.u32 %v2165_v63, %v2163_v4 }
 0x3ea   : > { %2412 = vmatprep.mubr.bf16.mxu0 %v2164_v24 }
 0x3eb   : > { %v2094_v32 = vpack.c.bf16 %v2066_v16, %v2063_v14  ;;  %v3315_v35 = vpop.f32.mrb[44].mxu0  ;;  %2413 = vmatmul.mubr.bf16.gmra.mrb[80].mxu0 %v2092_v17  ;;  %v4919_v38 = vsel %vm966_vm2, %v2280_v13, %v2284_v26 }
 0x3ec   : > { %v3316_v29 = vpop.f32.mrb[45].mxu0  ;;  %2492 = vmatpush1.bf16.msra.mxu0 %v4026_v37 }
 0x3ed   : > { %v3317_v30 = vadd.f32 %v3316_v29, %v3315_v35  ;;  %v3318_v21 = vpop.f32.mrb[46].mxu0  ;;  %v2169_v22 = vshll.u32 %v2094_v32, 16  ;;  %v2173_v39 = vshrl.u32 %v2094_v32, 16  ;;  %2493 = vmatprep.subr.bf16.mxu0 %v4027_v41  ;;  %v2233_v40 = vrot.slane %v2094_v32, 1 }
 0x3ee   : > { %v3319_v17 = vpop.f32.mrb[47].mxu0 }
 0x3ef   : > { %v3320_v42 = vadd.f32 %v3319_v17, %v3318_v21  ;;  %v2171_v48 = vrot.slane %v2169_v22, 1  ;;  %v2286_v51 = vrot.slane %v2173_v39, 1  ;;  %v2287_v55 = vrot.slane %v2169_v22, 2 }
 0x3f0   : > { %2494 = vmatpush1.bf16.msra.mxu0 %v4028_v54  ;;  %v4928_v13 = vsel %vm930_vm0, %v2231_v27, %v2233_v40  ;;  %v2071_v9 = vadd.f32 %v4756_v19, %v3317_v30 }
 0x3f1   : > { %v2074_v60 = vadd.f32 %v4756_v19, %v3320_v42  ;;  %v2172_v62 = vsel %vm810_vm1, %v2167_v45, %v2171_v48  ;;  %v2288_v43 = vor.u32 %v2287_v55, %v2286_v51  ;;  %v2175_v11 = vor.u32 %v2173_v39, %v2171_v48  ;;  %v2748_v55 = vld [vmem:[%s5230_s8 + $0xb8] sm:$0xff] }
 0x3f2   : > { %2422 = vmatprep.mubr.bf16.mxu0 %v2172_v62  ;;  %v2732_v62 = vld [vmem:[%s5230_s8 + $0x38] sm:$0xff] }
 0x3f3   : > { %v2095_v52 = vpack.c.bf16 %v2074_v60, %v2071_v9  ;;  %v3321_v57 = vpop.f32.mrb[48].mxu0  ;;  %2423 = vmatmul.mubr.bf16.gmra.mrb[84].mxu0 %v2093_v61  ;;  %v2289_v0 = vsel %vm966_vm2, %v2284_v26, %v2288_v43  ;;  %v2731_v60 = vld [vmem:[%s5230_s8 + $0x30] sm:$0xff] }
 0x3f4   : > { %v3322_v63 = vpop.f32.mrb[49].mxu0 }
 0x3f5   : > { %v3323_v58 = vadd.f32 %v3322_v63, %v3321_v57  ;;  %v3324_v1 = vpop.f32.mrb[50].mxu0  ;;  %v2177_v3 = vshll.u32 %v2095_v52, 16  ;;  %v2181_v4 = vshrl.u32 %v2095_v52, 16  ;;  %v2235_v27 = vrot.slane %v2095_v52, 1 }
 0x3f6   : > { %v3325_v5 = vpop.f32.mrb[51].mxu0  ;;  %v3511_v57 = vpack.c.bf16 %v2732_v62, %v2731_v60 }
 0x3f7   : > { %v3326_v56 = vadd.f32 %v3325_v5, %v3324_v1  ;;  %v2179_v14 = vrot.slane %v2177_v3, 1  ;;  %v2290_v16 = vrot.slane %v2181_v4, 1  ;;  %v2291_v24 = vrot.slane %v2177_v3, 2  ;;  %v2751_v1 = vld [vmem:[%s5230_s8 + $0xd0] sm:$0xff]  ;;  %v2752_v3 = vld [vmem:[%s5230_s8 + $0xd8] sm:$0xff] }
 0x3f8   : > { %v2236_v25 = vsel %vm930_vm0, %v2233_v40, %v2235_v27  ;;  %v2079_v35 = vadd.f32 %v4756_v19, %v3323_v58  ;;  %v2734_v58 = vld [vmem:[%s5230_s8 + $0x48] sm:$0xff]  ;;  %v2735_v5 = vld [vmem:[%s5230_s8 + $0x50] sm:$0xff] }
 0x3f9   : > { %v2082_v61 = vadd.f32 %v4756_v19, %v3326_v56  ;;  %v2180_v29 = vsel %vm810_vm1, %v2175_v11, %v2179_v14  ;;  %v2292_v26 = vor.u32 %v2291_v24, %v2290_v16  ;;  %v2183_v41 = vor.u32 %v2181_v4, %v2179_v14  ;;  %v2736_v56 = vld [vmem:[%s5230_s8 + $0x58] sm:$0xff]  ;;  %v2753_v11 = vld [vmem:[%s5230_s8 + $0xe0] sm:$0xff]  ;;  %v2754_v14 = vld [vmem:[%s5230_s8 + $0xe8] sm:$0xff] }
 0x3fa   : > { %2432 = vmatprep.mubr.bf16.mxu0 %v2180_v29  ;;  %v3519_v16 = vpack.c.bf16 %v2736_v56, %v2735_v5  ;;  %v3521_v24 = vpack.c.bf16 %v2754_v14, %v2753_v11  ;;  %v2756_v29 = vld [vmem:[%s5230_s8 + $0xf8] sm:$0xff] }
 0x3fb   : > { %v2096_v37 = vpack.c.bf16 %v2082_v61, %v2079_v35  ;;  %2433 = vmatmul.mubr.bf16.gmra.mrb[88].mxu0 %v2094_v32  ;;  %v2293_v30 = vsel %vm966_vm2, %v2288_v43, %v2292_v26  ;;  %v2730_v32 = vld [vmem:[%s5230_s8 + $0x28] sm:$0xff]  ;;  %v2749_v43 = vld [vmem:[%s5230_s8 + $0xc0] sm:$0xff]  ;;  %v2755_v61 = vld [vmem:[%s5230_s8 + $0xf0] sm:$0xff] }
 0x3fc   : > { %v2738_v35 = vld [vmem:[%s5230_s8 + $0x68] sm:$0xff] }
 0x3fd   : > { %v2185_v21 = vshll.u32 %v2096_v37, 16  ;;  %v2189_v22 = vshrl.u32 %v2096_v37, 16  ;;  %v2237_v39 = vrot.slane %v2096_v37, 1 }
 0x3ff   : > { %v2187_v17 = vrot.slane %v2185_v21, 1  ;;  %v2294_v42 = vrot.slane %v2189_v22, 1  ;;  %v2295_v45 = vrot.slane %v2185_v21, 2  ;;  %v2238_v40 = vsel %vm930_vm0, %v2235_v27, %v2237_v39  ;;  %v2740_v21 = vld [vmem:[%s5230_s8 + $0x78] sm:$0xff] }
 0x400   : > { %v3517_v27 = vpack.c.bf16 %v2752_v3, %v2751_v1 }
 0x401   : > { %v2188_v48 = vsel %vm810_vm1, %v2183_v41, %v2187_v17  ;;  %v2191_v19 = vor.u32 %v2189_v22, %v2187_v17  ;;  %v2296_v51 = vor.u32 %v2295_v45, %v2294_v42 }
 0x402   : > { %2442 = vmatprep.mubr.bf16.mxu0 %v2188_v48 }
 0x403   : > { %2443 = vmatmul.mubr.bf16.gmra.mrb[92].mxu0 %v2095_v52  ;;  %v2297_v54 = vsel %vm966_vm2, %v2292_v26, %v2296_v51  ;;  %v2750_v52 = vld [vmem:[%s5230_s8 + $0xc8] sm:$0xff] }
 0x404   : > { %2452 = vmatprep.mubr.bf16.mxu0 %v2191_v19  ;;  %v3513_v63 = vpack.c.bf16 %v2750_v52, %v2749_v43 }
 0x40b   : > { %2453 = vmatmul.mubr.bf16.gmra.mrb[96].mxu0 %v2096_v37  ;;  %v3525_v37 = vpack.c.bf16 %v2756_v29, %v2755_v61 }
 0x40c   : > { %2495 = vmatprep.mubr.bf16.mxu0 %v4772_v49  ;;  %v2742_v49 = vld [vmem:[%s5230_s8 + $0x88] sm:$0xff] }
 0x413   : > { %2496 = vmatmul.mubr.bf16.vlgmr.msra.gmra.mrb[52].mxu0 %v4763_v44  ;;  %v2741_v44 = vld [vmem:[%s5230_s8 + $0x80] sm:$0xff] }
 0x414   : > { %2505 = vmatprep.mubr.bf16.mxu0 %v4793_v36  ;;  %v3497_v36 = vpack.c.bf16 %v2742_v49, %v2741_v44 }
 0x416   : > { %3498 = vmatprep.subr.bf16.mxu1 %v3497_v36 }
 0x41b   : > { %2506 = vmatmul.mubr.bf16.gmra.mrb[56].mxu0 %v4781_v18  ;;  %v2725_v18 = vld [vmem:[%s5230_s8] sm:$0xff] }
 0x41c   : > { %2515 = vmatprep.mubr.bf16.mxu0 %v4814_v23  ;;  %v2744_v23 = vld [vmem:[%s5230_s8 + $0x98] sm:$0xff] }
 0x423   : > { %2516 = vmatmul.mubr.bf16.gmra.mrb[60].mxu0 %v4802_v53  ;;  %v2726_v53 = vld [vmem:[%s5230_s8 + $0x8] sm:$0xff] }
 0x424   : > { %2525 = vmatprep.mubr.bf16.mxu0 %v4835_v28 }
 0x42b   : > { %2526 = vmatmul.mubr.bf16.gmra.mrb[64].mxu0 %v4823_v7  ;;  %v3499_v7 = vpack.c.bf16 %v2726_v53, %v2725_v18 }
 0x42c   : > { %2535 = vmatprep.mubr.bf16.mxu0 %v4856_v34  ;;  %v2728_v34 = vld [vmem:[%s5230_s8 + $0x18] sm:$0xff] }
 0x42d   : > { %3500 = vmatpush3.bf16.msra.mxu1 %v3499_v7 }
 0x433   : > { %2536 = vmatmul.mubr.bf16.gmra.mrb[68].mxu0 %v4844_v46  ;;  %v2727_v46 = vld [vmem:[%s5230_s8 + $0x10] sm:$0xff] }
 0x434   : > { %2545 = vmatprep.mubr.bf16.mxu0 %v4877_v31  ;;  %v2746_v31 = vld [vmem:[%s5230_s8 + $0xa8] sm:$0xff] }
 0x43b   : > { %2546 = vmatmul.mubr.bf16.gmra.mrb[72].mxu0 %v4865_v2  ;;  %v2745_v2 = vld [vmem:[%s5230_s8 + $0xa0] sm:$0xff] }
 0x43c   : > { %2555 = vmatprep.mubr.bf16.mxu0 %v4898_v15  ;;  %v3505_v15 = vpack.c.bf16 %v2746_v31, %v2745_v2 }
 0x443   : > { %2556 = vmatmul.mubr.bf16.gmra.mrb[76].mxu0 %v4886_v47  ;;  %v3503_v47 = vpack.c.bf16 %v2728_v34, %v2727_v46 }
 0x444   : > { %2565 = vmatprep.mubr.bf16.mxu0 %v4919_v38  ;;  %v2747_v38 = vld [vmem:[%s5230_s8 + $0xb0] sm:$0xff] }
 0x445   : > { %v3509_v9 = vpack.c.bf16 %v2748_v55, %v2747_v38 }
 0x44b   : > { %2566 = vmatmul.mubr.bf16.gmra.mrb[80].mxu0 %v4907_v12  ;;  %v2729_v12 = vld [vmem:[%s5230_s8 + $0x20] sm:$0xff] }
 0x44c   : > { %2575 = vmatprep.mubr.bf16.mxu0 %v2289_v0  ;;  %v2733_v0 = vld [vmem:[%s5230_s8 + $0x40] sm:$0xff] }
 0x44d   : > { %v3515_v4 = vpack.c.bf16 %v2734_v58, %v2733_v0 }
 0x453   : > { %2576 = vmatmul.mubr.bf16.gmra.mrb[84].mxu0 %v4928_v13  ;;  %v3507_v13 = vpack.c.bf16 %v2730_v32, %v2729_v12 }
 0x454   : > { %2585 = vmatprep.mubr.bf16.mxu0 %v2293_v30  ;;  %v2739_v30 = vld [vmem:[%s5230_s8 + $0x70] sm:$0xff] }
 0x45b   : > { %2586 = vmatmul.mubr.bf16.gmra.mrb[88].mxu0 %v2236_v25  ;;  %v2737_v25 = vld [vmem:[%s5230_s8 + $0x60] sm:$0xff] }
 0x45c   : > { %2595 = vmatprep.mubr.bf16.mxu0 %v2297_v54  ;;  %v3523_v26 = vpack.c.bf16 %v2738_v35, %v2737_v25 }
 0x463   : > { %2596 = vmatmul.mubr.bf16.gmra.mrb[92].mxu0 %v2238_v40 }
 0x464   : > { %2605 = vmatprep.mubr.bf16.mxu0 %v2296_v51 }
 0x46b   : > { %2606 = vmatmul.mubr.bf16.gmra.mrb[96].mxu0 %v2237_v39  ;;  %v3527_v39 = vpack.c.bf16 %v2740_v21, %v2739_v30 }
 0x46c   : > { %3145 = vmatprep.mubr.msk.f32.mxu0 %vm1731_vm3, %v4506_v59  ;;  %v2743_v59 = vld [vmem:[%s5230_s8 + $0x90] sm:$0xff] }
 0x46d   : > { %v3501_v28 = vpack.c.bf16 %v2744_v23, %v2743_v59 }
 0x46f   : > { %3502 = vmatprep.subr.bf16.mxu1 %v3501_v28 }
 0x470   : > { %3504 = vmatpush3.bf16.msra.mxu1 %v3503_v47 }
 0x471   : > { %3506 = vmatprep.subr.bf16.mxu1 %v3505_v15 }
 0x474   : > { %3508 = vmatpush3.bf16.msra.mxu1 %v3507_v13 }
 0x475   : > { %3510 = vmatprep.subr.bf16.mxu1 %v3509_v9 }
 0x478   : > { %3512 = vmatpush3.bf16.msra.mxu1 %v3511_v57 }
 0x479   : > { %3514 = vmatprep.subr.bf16.mxu1 %v3513_v63 }
 0x47c   : > { %3516 = vmatpush3.bf16.msra.mxu1 %v3515_v4 }
 0x47d   : > { %3518 = vmatprep.subr.bf16.mxu1 %v3517_v27 }
 0x480   : > { %3520 = vmatpush3.bf16.msra.mxu1 %v3519_v16 }
 0x481   : > { %3522 = vmatprep.subr.bf16.mxu1 %v3521_v24 }
 0x484   : > { %3524 = vmatpush3.bf16.msra.mxu1 %v3523_v26 }
 0x485   : > { %3526 = vmatprep.subr.bf16.mxu1 %v3525_v37 }
 0x488   : > { %3528 = vmatpush3.bf16.msra.mxu1 %v3527_v39 }
 0x4e6   : > { %v2497_v22 = vpop.f32.mrb[52].mxu0 }
 0x4e7   : > { %v2499_v41 = vpop.f32.mrb[53].mxu0  ;;  %v3609_v42 = vadd.f32 %v2497_v22, %v4517_v6 }
 0x4e8   : > { %v2501_v17 = vpop.f32.mrb[54].mxu0  ;;  %v3610_v48 = vadd.f32 %v2499_v41, %v4519_v33 }
 0x4e9   : > { %v3611_v45 = vadd.f32 %v2501_v17, %v4517_v6  ;;  %v2503_v40 = vpop.f32.mrb[55].mxu0 }
 0x4ea   : > { %v3612_v19 = vadd.f32 %v2503_v40, %v4519_v33 }
 0x4eb   : > { %v3449_v51 = vpack.c.bf16 %v3611_v45, %v3609_v42 }
 0x4ec   : > { %v3447_v54 = vpack.c.bf16 %v3612_v19, %v3610_v48 }
 0x4ee   : > { %v2507_v44 = vpop.f32.mrb[56].mxu0  ;;  %3448 = vmatprep.subr.bf16.mxu0 %v3447_v54 }
 0x4ef   : > { %v2509_v49 = vpop.f32.mrb[57].mxu0  ;;  %3450 = vmatpush1.bf16.msra.mxu0 %v3449_v51  ;;  %v3613_v36 = vadd.f32 %v2507_v44, %v4517_v6 }
 0x4f0   : > { %v2511_v18 = vpop.f32.mrb[58].mxu0  ;;  %v3614_v23 = vadd.f32 %v2509_v49, %v4519_v33 }
 0x4f1   : > { %v3615_v53 = vadd.f32 %v2511_v18, %v4517_v6  ;;  %v2513_v59 = vpop.f32.mrb[59].mxu0 }
 0x4f2   : > { %v3616_v7 = vadd.f32 %v2513_v59, %v4519_v33 }
 0x4f3   : > { %v3453_v28 = vpack.c.bf16 %v3615_v53, %v3613_v36 }
 0x4f4   : > { %v3451_v46 = vpack.c.bf16 %v3616_v7, %v3614_v23 }
 0x4f6   : > { %v2517_v34 = vpop.f32.mrb[60].mxu0  ;;  %3452 = vmatprep.subr.bf16.mxu0 %v3451_v46 }
 0x4f7   : > { %v2519_v2 = vpop.f32.mrb[61].mxu0  ;;  %3454 = vmatpush1.bf16.msra.mxu0 %v3453_v28  ;;  %v3617_v47 = vadd.f32 %v2517_v34, %v4517_v6 }
 0x4f8   : > { %v2521_v31 = vpop.f32.mrb[62].mxu0  ;;  %v3618_v32 = vadd.f32 %v2519_v2, %v4519_v33 }
 0x4f9   : > { %v3619_v15 = vadd.f32 %v2521_v31, %v4517_v6  ;;  %v2523_v12 = vpop.f32.mrb[63].mxu0 }
 0x4fa   : > { %v3620_v38 = vadd.f32 %v2523_v12, %v4519_v33 }
 0x4fb   : > { %v3457_v55 = vpack.c.bf16 %v3619_v15, %v3617_v47 }
 0x4fc   : > { %v3455_v13 = vpack.c.bf16 %v3620_v38, %v3618_v32 }
 0x4fe   : > { %v2527_v9 = vpop.f32.mrb[64].mxu0  ;;  %3456 = vmatprep.subr.bf16.mxu0 %v3455_v13 }
 0x4ff   : > { %v2529_v60 = vpop.f32.mrb[65].mxu0  ;;  %3458 = vmatpush1.bf16.msra.mxu0 %v3457_v55  ;;  %v3621_v43 = vadd.f32 %v2527_v9, %v4517_v6 }
 0x500   : > { %v2531_v62 = vpop.f32.mrb[66].mxu0  ;;  %v3622_v63 = vadd.f32 %v2529_v60, %v4519_v33 }
 0x501   : > { %v3623_v52 = vadd.f32 %v2531_v62, %v4517_v6  ;;  %v2533_v57 = vpop.f32.mrb[67].mxu0 }
 0x502   : > { %v3624_v0 = vadd.f32 %v2533_v57, %v4519_v33 }
 0x503   : > { %v3461_v58 = vpack.c.bf16 %v3623_v52, %v3621_v43 }
 0x504   : > { %v3459_v1 = vpack.c.bf16 %v3624_v0, %v3622_v63 }
 0x506   : > { %v2537_v3 = vpop.f32.mrb[68].mxu0  ;;  %3460 = vmatprep.subr.bf16.mxu0 %v3459_v1 }
 0x507   : > { %v2539_v4 = vpop.f32.mrb[69].mxu0  ;;  %3462 = vmatpush1.bf16.msra.mxu0 %v3461_v58  ;;  %v3625_v5 = vadd.f32 %v2537_v3, %v4517_v6 }
 0x508   : > { %v2541_v27 = vpop.f32.mrb[70].mxu0  ;;  %v3626_v14 = vadd.f32 %v2539_v4, %v4519_v33 }
 0x509   : > { %v3627_v56 = vadd.f32 %v2541_v27, %v4517_v6  ;;  %v2543_v11 = vpop.f32.mrb[71].mxu0 }
 0x50a   : > { %v3628_v16 = vadd.f32 %v2543_v11, %v4519_v33 }
 0x50b   : > { %v3465_v24 = vpack.c.bf16 %v3627_v56, %v3625_v5 }
 0x50c   : > { %v3463_v25 = vpack.c.bf16 %v3628_v16, %v3626_v14 }
 0x50e   : > { %v2547_v35 = vpop.f32.mrb[72].mxu0  ;;  %3464 = vmatprep.subr.bf16.mxu0 %v3463_v25 }
 0x50f   : > { %v2549_v61 = vpop.f32.mrb[73].mxu0  ;;  %3466 = vmatpush1.bf16.msra.mxu0 %v3465_v24  ;;  %v3629_v26 = vadd.f32 %v2547_v35, %v4517_v6 }
 0x510   : > { %v2551_v29 = vpop.f32.mrb[74].mxu0  ;;  %v3630_v21 = vadd.f32 %v2549_v61, %v4519_v33 }
 0x511   : > { %v3631_v37 = vadd.f32 %v2551_v29, %v4517_v6  ;;  %v2553_v30 = vpop.f32.mrb[75].mxu0 }
 0x512   : > { %v3632_v22 = vadd.f32 %v2553_v30, %v4519_v33 }
 0x513   : > { %v3469_v39 = vpack.c.bf16 %v3631_v37, %v3629_v26 }
 0x514   : > { %v3467_v41 = vpack.c.bf16 %v3632_v22, %v3630_v21 }
 0x516   : > { %v2557_v17 = vpop.f32.mrb[76].mxu0  ;;  %3468 = vmatprep.subr.bf16.mxu0 %v3467_v41 }
 0x517   : > { %v2559_v42 = vpop.f32.mrb[77].mxu0  ;;  %3470 = vmatpush1.bf16.msra.mxu0 %v3469_v39  ;;  %v3633_v40 = vadd.f32 %v2557_v17, %v4517_v6 }
 0x518   : > { %v2561_v45 = vpop.f32.mrb[78].mxu0  ;;  %v3634_v51 = vadd.f32 %v2559_v42, %v4519_v33 }
 0x519   : > { %v3635_v48 = vadd.f32 %v2561_v45, %v4517_v6  ;;  %v2563_v19 = vpop.f32.mrb[79].mxu0  ;;  %v4029_v45 = vld [vmem:[%s5224_s2] sm:$0xff] }
 0x51a   : > { %v3636_v54 = vadd.f32 %v2563_v19, %v4519_v33  ;;  %v2711_v19 = vld [vmem:[%s5229_s7 + $0x90] sm:$0xff] }
 0x51b   : > { %v3473_v44 = vpack.c.bf16 %v3635_v48, %v3633_v40  ;;  %v2694_v48 = vld [vmem:[%s5229_s7 + $0x8] sm:$0xff] }
 0x51c   : > { %v3471_v49 = vpack.c.bf16 %v3636_v54, %v3634_v51  ;;  %v2712_v51 = vld [vmem:[%s5229_s7 + $0x98] sm:$0xff] }
 0x51e   : > { %v2567_v18 = vpop.f32.mrb[80].mxu0  ;;  %3472 = vmatprep.subr.bf16.mxu0 %v3471_v49 }
 0x51f   : > { %v2569_v36 = vpop.f32.mrb[81].mxu0  ;;  %3474 = vmatpush1.bf16.msra.mxu0 %v3473_v44  ;;  %v3637_v59 = vadd.f32 %v2567_v18, %v4517_v6  ;;  %v3531_v44 = vpack.c.bf16 %v2694_v48, %v2693_v50  ;;  %v3533_v18 = vpack.c.bf16 %v2712_v51, %v2711_v19 }
 0x520   : > { %v2571_v53 = vpop.f32.mrb[82].mxu0  ;;  %v3638_v28 = vadd.f32 %v2569_v36, %v4519_v33  ;;  %v2695_v36 = vld [vmem:[%s5229_s7 + $0x10] sm:$0xff] }
 0x521   : > { %v3639_v23 = vadd.f32 %v2571_v53, %v4517_v6  ;;  %v2573_v7 = vpop.f32.mrb[83].mxu0  ;;  %v2696_v53 = vld [vmem:[%s5229_s7 + $0x18] sm:$0xff] }
 0x522   : > { %v3640_v46 = vadd.f32 %v2573_v7, %v4519_v33  ;;  %v3535_v7 = vpack.c.bf16 %v2696_v53, %v2695_v36 }
 0x523   : > { %v3477_v34 = vpack.c.bf16 %v3639_v23, %v3637_v59  ;;  %v2713_v59 = vld [vmem:[%s5229_s7 + $0xa0] sm:$0xff]  ;;  %v2714_v23 = vld [vmem:[%s5229_s7 + $0xa8] sm:$0xff] }
 0x524   : > { %v3475_v2 = vpack.c.bf16 %v3640_v46, %v3638_v28  ;;  %v3537_v28 = vpack.c.bf16 %v2714_v23, %v2713_v59  ;;  %v2697_v46 = vld [vmem:[%s5229_s7 + $0x20] sm:$0xff] }
 0x526   : > { %v2577_v31 = vpop.f32.mrb[84].mxu0  ;;  %3476 = vmatprep.subr.bf16.mxu0 %v3475_v2  ;;  %v2715_v2 = vld [vmem:[%s5229_s7 + $0xb0] sm:$0xff] }
 0x527   : > { %v2579_v47 = vpop.f32.mrb[85].mxu0  ;;  %3478 = vmatpush1.bf16.msra.mxu0 %v3477_v34  ;;  %v3641_v12 = vadd.f32 %v2577_v31, %v4517_v6  ;;  %v2698_v34 = vld [vmem:[%s5229_s7 + $0x28] sm:$0xff]  ;;  %v2716_v31 = vld [vmem:[%s5229_s7 + $0xb8] sm:$0xff] }
 0x528   : > { %v2581_v15 = vpop.f32.mrb[86].mxu0  ;;  %v3642_v55 = vadd.f32 %v2579_v47, %v4519_v33  ;;  %v3541_v47 = vpack.c.bf16 %v2716_v31, %v2715_v2 }
 0x529   : > { %v3643_v32 = vadd.f32 %v2581_v15, %v4517_v6  ;;  %v2583_v38 = vpop.f32.mrb[87].mxu0  ;;  %v2699_v15 = vld [vmem:[%s5229_s7 + $0x30] sm:$0xff] }
 0x52a   : > { %v3644_v13 = vadd.f32 %v2583_v38, %v4519_v33  ;;  %v2718_v38 = vld [vmem:[%s5229_s7 + $0xc8] sm:$0xff] }
 0x52b   : > { %v3481_v9 = vpack.c.bf16 %v3643_v32, %v3641_v12  ;;  %v2700_v12 = vld [vmem:[%s5229_s7 + $0x38] sm:$0xff]  ;;  %v2717_v32 = vld [vmem:[%s5229_s7 + $0xc0] sm:$0xff] }
 0x52c   : > { %v3479_v60 = vpack.c.bf16 %v3644_v13, %v3642_v55  ;;  %v3543_v55 = vpack.c.bf16 %v2700_v12, %v2699_v15  ;;  %v3545_v13 = vpack.c.bf16 %v2718_v38, %v2717_v32 }
 0x52e   : > { %v2587_v62 = vpop.f32.mrb[88].mxu0  ;;  %3480 = vmatprep.subr.bf16.mxu0 %v3479_v60  ;;  %v2702_v60 = vld [vmem:[%s5229_s7 + $0x48] sm:$0xff] }
 0x52f   : > { %v2589_v43 = vpop.f32.mrb[89].mxu0  ;;  %3482 = vmatpush1.bf16.msra.mxu0 %v3481_v9  ;;  %v3645_v57 = vadd.f32 %v2587_v62, %v4517_v6  ;;  %v2701_v9 = vld [vmem:[%s5229_s7 + $0x40] sm:$0xff]  ;;  %v2719_v62 = vld [vmem:[%s5229_s7 + $0xd0] sm:$0xff] }
 0x530   : > { %v2591_v52 = vpop.f32.mrb[90].mxu0  ;;  %v3646_v58 = vadd.f32 %v2589_v43, %v4519_v33  ;;  %v2720_v43 = vld [vmem:[%s5229_s7 + $0xd8] sm:$0xff] }
 0x531   : > { %v3647_v63 = vadd.f32 %v2591_v52, %v4517_v6  ;;  %v2593_v0 = vpop.f32.mrb[91].mxu0  ;;  %v3547_v52 = vpack.c.bf16 %v2702_v60, %v2701_v9 }
 0x532   : > { %v3648_v1 = vadd.f32 %v2593_v0, %v4519_v33  ;;  %v2704_v0 = vld [vmem:[%s5229_s7 + $0x58] sm:$0xff] }
 0x533   : > { %v3485_v3 = vpack.c.bf16 %v3647_v63, %v3645_v57  ;;  %v3549_v57 = vpack.c.bf16 %v2720_v43, %v2719_v62  ;;  %v2703_v63 = vld [vmem:[%s5229_s7 + $0x50] sm:$0xff] }
 0x534   : > { %v3483_v4 = vpack.c.bf16 %v3648_v1, %v3646_v58  ;;  %v2721_v58 = vld [vmem:[%s5229_s7 + $0xe0] sm:$0xff]  ;;  %v2722_v1 = vld [vmem:[%s5229_s7 + $0xe8] sm:$0xff] }
 0x536   : > { %v2597_v27 = vpop.f32.mrb[92].mxu0  ;;  %3484 = vmatprep.subr.bf16.mxu0 %v3483_v4  ;;  %v3553_v4 = vpack.c.bf16 %v2722_v1, %v2721_v58 }
 0x537   : > { %v2599_v5 = vpop.f32.mrb[93].mxu0  ;;  %3486 = vmatpush1.bf16.msra.mxu0 %v3485_v3  ;;  %v3649_v11 = vadd.f32 %v2597_v27, %v4517_v6  ;;  %v3551_v3 = vpack.c.bf16 %v2704_v0, %v2703_v63  ;;  %v2705_v27 = vld [vmem:[%s5229_s7 + $0x60] sm:$0xff] }
 0x538   : > { %v2601_v56 = vpop.f32.mrb[94].mxu0  ;;  %v3650_v24 = vadd.f32 %v2599_v5, %v4519_v33  ;;  %v2706_v5 = vld [vmem:[%s5229_s7 + $0x68] sm:$0xff] }
 0x539   : > { %v3651_v14 = vadd.f32 %v2601_v56, %v4517_v6  ;;  %v2603_v16 = vpop.f32.mrb[95].mxu0  ;;  %v2723_v56 = vld [vmem:[%s5229_s7 + $0xf0] sm:$0xff] }
 0x53a   : > { %v3652_v25 = vadd.f32 %v2603_v16, %v4519_v33 }
 0x53b   : > { %v3489_v35 = vpack.c.bf16 %v3651_v14, %v3649_v11  ;;  %v2724_v11 = vld [vmem:[%s5229_s7 + $0xf8] sm:$0xff]  ;;  %v3555_v14 = vpack.c.bf16 %v2706_v5, %v2705_v27 }
 0x53c   : > { %v3487_v61 = vpack.c.bf16 %v3652_v25, %v3650_v24  ;;  %v3557_v16 = vpack.c.bf16 %v2724_v11, %v2723_v56  ;;  %v2707_v24 = vld [vmem:[%s5229_s7 + $0x70] sm:$0xff]  ;;  %v2708_v25 = vld [vmem:[%s5229_s7 + $0x78] sm:$0xff] }
 0x53e   : > { %v2607_v29 = vpop.f32.mrb[96].mxu0  ;;  %3488 = vmatprep.subr.bf16.mxu0 %v3487_v61 }
 0x53f   : > { %v2609_v26 = vpop.f32.mrb[97].mxu0  ;;  %3490 = vmatpush1.bf16.msra.mxu0 %v3489_v35  ;;  %v3653_v30 = vadd.f32 %v2607_v29, %v4517_v6  ;;  %v3559_v35 = vpack.c.bf16 %v2708_v25, %v2707_v24 }
 0x540   : > { %v2611_v37 = vpop.f32.mrb[98].mxu0  ;;  %v3654_v39 = vadd.f32 %v2609_v26, %v4519_v33 }
 0x541   : > { %v3655_v21 = vadd.f32 %v2611_v37, %v4517_v6  ;;  %v2613_v22 = vpop.f32.mrb[99].mxu0  ;;  %v2709_v6 = vld [vmem:[%s5229_s7 + $0x80] sm:$0xff]  ;;  %v4039_v37 = vmov 1966171168  }
 0x542   : > { %v3656_v41 = vadd.f32 %v2613_v22, %v4519_v33  ;;  %v2710_v33 = vld [vmem:[%s5229_s7 + $0x88] sm:$0xff] }
 0x543   : > { %v3494_v17 = vpack.c.bf16 %v3655_v21, %v3653_v30  ;;  %v3529_v40 = vpack.c.bf16 %v2710_v33, %v2709_v6  ;;  %v2907_v30 = vunpack.c.l.s4 %v4039_v37 }
 0x544   : > { %v3491_v42 = vpack.c.bf16 %v3656_v41, %v3654_v39 }
 0x545   : > { %3530 = vmatprep.subr.bf16.mxu1 %v3529_v40  ;;  %v2908_v22 = vunpack.c.0.s8 %v2907_v30 }
 0x546   : > { %3493 = vmatprep.subr.msk.bf16.mxu0 %vm4569_vm6, %v3491_v42 }
 0x547   : > { %3496 = vmatpush1.bf16.msk.msra.mxu0 %vm4569_vm6, %v3494_v17  ;;  %v3146_v17 = vld [vmem:[%s5231_s9] ss:$0 sm:$0xff] }
 0x54a   : > { %2687 = vmatmul.mubr.f32.vlgmr.msra.gmra.mrb[2].mxu0 %v4029_v45  ;;  %v2911_v45 = vsub.s32 %v2908_v22, %v4510_v20 }
 0x61d   : > { %v2688_v54 = vpop.f32.mrb[2].mxu0 }
 0x61e   : > { %v2690_v49 = vpop.f32.mrb[3].mxu0 }
 0x61f   : > { %2821 = vmatprep.mubr.f32.mxu1 %v2690_v49 }
 0x620   : > { %2822 = vmatmul.mubr.f32.vlgmr.msra.gmra.mrb[96].mxu1 %v2688_v54 }
 0x621   : > { %3532 = vmatpush3.bf16.msra.mxu1 %v3531_v44  ;;  %2891 = vmatprep.mubr.f32.mxu1 %v4751_v10  ;;  %v3539_v10 = vpack.c.bf16 %v2698_v34, %v2697_v46 }
 0x622   : > { %3534 = vmatprep.subr.bf16.mxu1 %v3533_v18 }
 0x625   : > { %3536 = vmatpush3.bf16.msra.mxu1 %v3535_v7 }
 0x626   : > { %3538 = vmatprep.subr.bf16.mxu1 %v3537_v28 }
 0x629   : > { %3540 = vmatpush3.bf16.msra.mxu1 %v3539_v10 }
 0x62a   : > { %3542 = vmatprep.subr.bf16.mxu1 %v3541_v47 }
 0x62d   : > { %3544 = vmatpush3.bf16.msra.mxu1 %v3543_v55 }
 0x62e   : > { %3546 = vmatprep.subr.bf16.mxu1 %v3545_v13 }
 0x631   : > { %3548 = vmatpush3.bf16.msra.mxu1 %v3547_v52 }
 0x632   : > { %3550 = vmatprep.subr.bf16.mxu1 %v3549_v57 }
 0x635   : > { %3552 = vmatpush3.bf16.msra.mxu1 %v3551_v3 }
 0x636   : > { %3554 = vmatprep.subr.bf16.mxu1 %v3553_v4 }
 0x639   : > { %3556 = vmatpush3.bf16.msra.mxu1 %v3555_v14 }
 0x63a   : > { %3558 = vmatprep.subr.bf16.mxu1 %v3557_v16 }
 0x63d   : > { %3560 = vmatpush3.bf16.msra.mxu1 %v3559_v35 }
 0x640   : > { %2892 = vmatmul.mubr.f32.vlgmr.msra.gmra.mrb[98].mxu1 %v4749_v8 }
 0x6f3   : > { %v3359_v61 = vpop.f32.mrb[96].mxu1 }
 0x6f4   : > { %v3360_v29 = vpop.f32.mrb[97].mxu1 }
 0x6f5   : > { %v3361_v26 = vadd.f32 %v3360_v29, %v3359_v61 }
 0x713   : > { %v3394_v21 = vpop.f32.mrb[98].mxu1 }
 0x714   : > { %v3395_v39 = vpop.f32.mrb[99].mxu1 }
 0x715   : > { %v3396_v41 = vadd.f32 %v3395_v39, %v3394_v21 }
 0x717   : > { %v2894_v42 = vadd.f32 %v3396_v41, %v3361_v26 }
 0x719   : > { %v2904_v8 = vadd.f32 %v3146_v17, %v2894_v42 }
 0x71b   : > { %v2912_v6 = vrot.slane %v2904_v8, %v2911_v45 }
 0x71d   : > { %v2913_v33 = vcombine.high %v2912_v6, %v2912_v6  ;;  %v2920_v40 = vrot.slane %v2912_v6, %v2911_v45 }
 0x71f   : > { %v2927_v50 = vrot.slane %v2913_v33, %v2911_v45  ;;  %v2928_v48 = vcombine.high %v2920_v40, %v2920_v40  ;;  %2935 = vst.msk [vmem:[%s387_s22] sm:$0x1] %vm2934_vm7, %v2920_v40 }
 0x721   : > { %v2929_v19 = vcombine.high %v2927_v50, %v2927_v50  ;;  %2936 = vst.msk [vmem:[%s387_s22 + $0x1] sm:$0x1] %vm2934_vm7, %v2927_v50  ;;  %2937 = vst.msk [vmem:[%s387_s22 + $0x2] sm:$0x1] %vm2934_vm7, %v2928_v48 }
 0x723   : > { %2938 = vst.msk [vmem:[%s387_s22 + $0x3] sm:$0x1] %vm2934_vm7, %v2929_v19 }
 0x724 PF: > { %s20_s13 = sadd.s32 1, %s4036_s13  }
 0x725   : > { %p17_p5 = scmp.ge.s32.totalorder %s20_s13, 4  }
 0x727   :  { %19 = sbr.rel (!%p17_p5) target bundleno = 1 (0x1), region = 93 }

</bundles_post_ra>
